<compile_context>
chip_gen: v6e
topology: v6e:2x2x1
jax: 0.10.0
libtpu: 0.0.40
codegen_flags: <defaults>
</compile_context>

<pallas_src>
import functools

import jax
import jax.numpy as jnp
from jax import lax
from jax.experimental import pallas as pl
from jax.experimental.pallas import tpu as pltpu

BN_EPS = 1e-5


# ----------------------------------------------------------------------------
# Pallas helpers
# ----------------------------------------------------------------------------
def _cparams(sem):
    # 48 MiB: fits comfortably under v7x's 64 MiB physical VMEM (double-buffer headroom)
    # and is far above the per-tile working set at the default 512-row tiles.
    return pltpu.CompilerParams(dimension_semantics=sem,
                                vmem_limit_bytes=48 * 1024 * 1024)


def _full2d(a):
    return pl.BlockSpec(a.shape, lambda i: (0, 0))


def _pick_tile(rows, target):
    """Largest row-tile <= target that divides `rows` and is a multiple of 8."""
    if rows <= target:
        return rows
    for t in range(target - target % 8, 7, -8):
        if rows % t == 0:
            return t
    return rows  # fall back to a single full-extent tile


# ----------------------------------------------------------------------------
# Wrapper-side layout plumbing (pure data movement, XLA)
# ----------------------------------------------------------------------------
def _im2col_3x3(x):
    """x: (B, H, W, C) -> (B, H, W, 9*C); zero-padded 3x3 patches, columns (tap, c)."""
    B, H, W, C = x.shape
    xp = jnp.pad(x, ((0, 0), (1, 1), (1, 1), (0, 0)))
    taps = [xp[:, ky:ky + H, kx:kx + W, :] for ky in range(3) for kx in range(3)]
    return jnp.concatenate(taps, axis=-1)


def _pool_group_rows(a):
    """a: (B, H, W, K), H/W even -> (4, B*(H//2)*(W//2), K).

    Leading axis t = 2*dy+dx holds spatial position (2i+dy, 2j+dx) at inner row
    b*H2*W2 + i*W2 + j, so a 2x2 pool is a reduction over the leading tap axis and
    the result is flat row-major over (B, H2, W2)."""
    B, H, W, K = a.shape
    H2, W2 = H // 2, W // 2
    a = a.reshape(B, H2, 2, W2, 2, K).transpose(2, 4, 0, 1, 3, 5)
    return a.reshape(4, B * H2 * W2, K)


# ----------------------------------------------------------------------------
# Pass 1 (shared): conv matmul + per-channel sum / sum-of-squares accumulation
# ----------------------------------------------------------------------------
def _bn_stats_kernel(cols_ref, w_ref, sum_ref, sq_ref):
    @pl.when(pl.program_id(0) == 0)
    def _():
        sum_ref[...] = jnp.zeros_like(sum_ref)
        sq_ref[...] = jnp.zeros_like(sq_ref)

    t, tr, k = cols_ref.shape
    conv = jnp.dot(cols_ref[...].reshape(t * tr, k), w_ref[...],
                   preferred_element_type=jnp.float32)            # (4*tr, C) fp32
    sum_ref[...] += jnp.sum(conv, axis=0, keepdims=True)
    sq_ref[...] += jnp.sum(conv * conv, axis=0, keepdims=True)


def bn_stats(cols, w, tile_rows):
    T, R, K = cols.shape
    C = w.shape[-1]
    return pl.pallas_call(
        _bn_stats_kernel,
        out_shape=(jax.ShapeDtypeStruct((1, C), jnp.float32),
                   jax.ShapeDtypeStruct((1, C), jnp.float32)),
        grid=(R // tile_rows,),
        in_specs=[pl.BlockSpec((T, tile_rows, K), lambda i: (0, i, 0)),
                  _full2d(w)],
        out_specs=(pl.BlockSpec((1, C), lambda i: (0, 0)),
                   pl.BlockSpec((1, C), lambda i: (0, 0))),
        compiler_params=_cparams(("arbitrary",)),
    )(cols, w)


def _bn_affine(sum_ref, sq_ref, g_ref, be_ref, n_rows):
    """Train-mode BN (biased var) folded into per-channel scale/shift, fp32."""
    inv_n = 1.0 / float(n_rows)
    mean = sum_ref[...] * inv_n
    var = jnp.maximum(sq_ref[...] * inv_n - mean * mean, 0.0)
    scale = g_ref[...] * lax.rsqrt(var + BN_EPS)
    shift = be_ref[...] - mean * scale
    return scale, shift


# ----------------------------------------------------------------------------
# Kernel A pass 2: conv1 (recompute) + BN + ReLU + 2x2 max pool  -> bf16 x1 tile
# ----------------------------------------------------------------------------
def _conv1_bn_relu_pool_kernel(cols_ref, w_ref, sum_ref, sq_ref, g_ref, be_ref,
                               out_ref, *, n_rows):
    t, tr, k = cols_ref.shape
    conv = jnp.dot(cols_ref[...].reshape(t * tr, k), w_ref[...],
                   preferred_element_type=jnp.float32)            # (4*tr, 64)
    scale, shift = _bn_affine(sum_ref, sq_ref, g_ref, be_ref, n_rows)
    y = jnp.maximum(conv * scale + shift, 0.0)                    # BN + ReLU
    pooled = jnp.maximum(jnp.maximum(y[0:tr], y[tr:2 * tr]),
                         jnp.maximum(y[2 * tr:3 * tr], y[3 * tr:4 * tr]))
    out_ref[...] = pooled.astype(out_ref.dtype)                   # bf16 writeback


def conv1_block(cols1, w1, s1, q1, g1, be1, tile_rows):
    T, R, K = cols1.shape
    C = w1.shape[-1]
    kern = functools.partial(_conv1_bn_relu_pool_kernel, n_rows=T * R)
    return pl.pallas_call(
        kern,
        out_shape=jax.ShapeDtypeStruct((R, C), jnp.bfloat16),
        grid=(R // tile_rows,),
        in_specs=[pl.BlockSpec((T, tile_rows, K), lambda i: (0, i, 0)),
                  _full2d(w1), _full2d(s1), _full2d(q1), _full2d(g1), _full2d(be1)],
        out_specs=pl.BlockSpec((tile_rows, C), lambda i: (i, 0)),
        compiler_params=_cparams(("parallel",)),
    )(cols1, w1, s1, q1, g1, be1)


# ----------------------------------------------------------------------------
# Kernel B pass 2: conv2 (recompute) + BN + ReLU + maxpool + avgpool(x1 from
#   cols2 centre tap) + concat-conv(1x1) + ReLU + upconv (fused 4-tap matmul)
#   + ReLU + detection head (block-diagonal, lane-dense 256-wide output)
# ----------------------------------------------------------------------------
def _layer2_head_kernel(cols_ref, w2_ref, sum_ref, sq_ref, g2_ref, be2_ref,
                        wc1_ref, wc2_ref, bc_ref, wt_ref, bu_ref, wd_ref, bd_ref,
                        out_ref, *, n_rows):
    t, tr, k = cols_ref.shape
    cols = cols_ref[...]                                           # (4, tr, 576) bf16

    # conv2 (im2col matmul, recomputed after the stats pass)
    conv = jnp.dot(cols.reshape(t * tr, k), w2_ref[...],
                   preferred_element_type=jnp.float32)             # (4*tr, 128)

    # BN (train-mode, precomputed sums) + ReLU + 2x2 max pool (tap-slab max)
    scale, shift = _bn_affine(sum_ref, sq_ref, g2_ref, be2_ref, n_rows)
    y = jnp.maximum(conv * scale + shift, 0.0)
    x2 = jnp.maximum(jnp.maximum(y[0:tr], y[tr:2 * tr]),
                     jnp.maximum(y[2 * tr:3 * tr], y[3 * tr:4 * tr]))   # (tr, 128)

    # adaptive_avg_pool2d(x1, x2.shape[2:]) == exact 2x2 mean pool of x1.
    # x1 is exactly the centre-tap columns [256:320] of cols2 (lane-aligned).
    c0 = 4 * 64
    xa = 0.25 * (cols[0, :, c0:c0 + 64].astype(jnp.float32)
                 + cols[1, :, c0:c0 + 64].astype(jnp.float32)
                 + cols[2, :, c0:c0 + 64].astype(jnp.float32)
                 + cols[3, :, c0:c0 + 64].astype(jnp.float32))          # (tr, 64)

    # concat + 1x1 conv (192 -> 256) fused as split-weight matmuls, + ReLU
    fused = jnp.maximum(
        jnp.dot(xa.astype(jnp.bfloat16), wc1_ref[...], preferred_element_type=jnp.float32)
        + jnp.dot(x2.astype(jnp.bfloat16), wc2_ref[...], preferred_element_type=jnp.float32)
        + bc_ref[...], 0.0)                                             # (tr, 256)

    # ConvTranspose2d(256->128, k=2, s=2): the 4 taps fused into one (256, 512) matmul
    up = jnp.maximum(
        jnp.dot(fused.astype(jnp.bfloat16), wt_ref[...], preferred_element_type=jnp.float32)
        + bu_ref[...], 0.0)                                             # (tr, 512)

    # detection head per tap via a block-diagonal (512, 4*64) weight
    # (45 real channels + 19 zero columns per tap -> lane-dense 256-wide output)
    out_ref[...] = (jnp.dot(up.astype(jnp.bfloat16), wd_ref[...],
                            preferred_element_type=jnp.float32) + bd_ref[...])


def layer2_head_block(cols2, w2, s2, q2, g2, be2, wc1, wc2, bc, wt, bu, wdb, bdb,
                      tile_rows):
    T, R, K = cols2.shape
    kern = functools.partial(_layer2_head_kernel, n_rows=T * R)
    rest = (w2, s2, q2, g2, be2, wc1, wc2, bc, wt, bu, wdb, bdb)
    return pl.pallas_call(
        kern,
        out_shape=jax.ShapeDtypeStruct((R, 256), jnp.float32),
        grid=(R // tile_rows,),
        in_specs=[pl.BlockSpec((T, tile_rows, K), lambda i: (0, i, 0))]
                 + [_full2d(a) for a in rest],
        out_specs=pl.BlockSpec((tile_rows, 256), lambda i: (i, 0)),
        compiler_params=_cparams(("parallel",)),
    )(cols2, *rest)


# ----------------------------------------------------------------------------
# torchvision AnchorGenerator(sizes=((16,32,64),), aspect_ratios=((0.5,1,2),))
# Pure index math (no input data flows through it) -> plain JAX.
# ----------------------------------------------------------------------------
def generate_anchors(image_size, feat_size):
    scales = jnp.array([16.0, 32.0, 64.0], jnp.float32)
    ratios = jnp.array([0.5, 1.0, 2.0], jnp.float32)
    h_r = jnp.sqrt(ratios)
    w_r = 1.0 / h_r
    ws = (w_r[:, None] * scales[None, :]).reshape(-1)
    hs = (h_r[:, None] * scales[None, :]).reshape(-1)
    base = jnp.round(jnp.stack([-ws, -hs, ws, hs], axis=1) / 2.0)          # (9, 4)
    stride_h = image_size[0] // feat_size[0]
    stride_w = image_size[1] // feat_size[1]
    shifts_x = jnp.arange(feat_size[1], dtype=jnp.float32) * stride_w
    shifts_y = jnp.arange(feat_size[0], dtype=jnp.float32) * stride_h
    sy, sx = jnp.meshgrid(shifts_y, shifts_x, indexing="ij")
    sx = sx.reshape(-1)
    sy = sy.reshape(-1)
    shifts = jnp.stack([sx, sy, sx, sy], axis=1)                           # (HW, 4)
    return (shifts[:, None, :] + base[None, :, :]).reshape(-1, 4)          # (HW*9, 4)


# ----------------------------------------------------------------------------
# Parameter packing for the kernels (bf16 matmul operands, fp32 BN/biases)
# ----------------------------------------------------------------------------
def _pack_params(p):
    w1 = p["w1"].reshape(9 * 1, 64).astype(jnp.bfloat16)                   # (9, 64)
    w2 = p["w2"].reshape(9 * 64, 128).astype(jnp.bfloat16)                 # (576, 128)
    wc1 = p["wc1"].astype(jnp.bfloat16)                                    # (64, 256)
    wc2 = p["wc2"].astype(jnp.bfloat16)                                    # (128, 256)
    # upconv taps (t = dy*2 + dx) concatenated along the output dim -> (256, 512)
    wt = jnp.transpose(p["wu"], (1, 0, 2)).reshape(256, 4 * 128).astype(jnp.bfloat16)
    bu = jnp.tile(p["bu"], (1, 4))                                         # (1, 512)
    # detection head: block-diagonal (512, 256), 45 cols zero-padded to 64 per tap
    wd_pad = jnp.pad(p["wd"], ((0, 0), (0, 64 - 45)))                      # (128, 64)
    wdb = jnp.zeros((4 * 128, 4 * 64), jnp.float32)
    for t in range(4):
        wdb = wdb.at[t * 128:(t + 1) * 128, t * 64:(t + 1) * 64].set(wd_pad)
    wdb = wdb.astype(jnp.bfloat16)
    bdb = jnp.tile(jnp.pad(p["bd"], ((0, 0), (0, 64 - 45))), (1, 4))       # (1, 256)
    return dict(w1=w1, g1=p["g1"], be1=p["be1"],
                w2=w2, g2=p["g2"], be2=p["be2"],
                wc1=wc1, wc2=wc2, bc=p["bc"],
                wt=wt, bu=bu, wdb=wdb, bdb=bdb)


# ----------------------------------------------------------------------------
# Full forward pass
# ----------------------------------------------------------------------------
def text_detection_forward(x_nchw, p, tile_rows=512):
    B, Cin, H, W = x_nchw.shape
    assert Cin == 1, "TextDetectionNet expects a single input channel"
    assert H % 4 == 0 and W % 4 == 0, "layout tricks require H, W divisible by 4"
    H1, W1 = H // 2, W // 2
    H2, W2 = H1 // 2, W1 // 2
    q = _pack_params(p)

    # bf16 in HBM for all matmul LHS streams (values identical to an in-kernel cast)
    x = jnp.transpose(x_nchw, (0, 2, 3, 1)).astype(jnp.bfloat16)           # (B, H, W, 1)

    # --- layer 1: conv1 + bn1(train stats, two-pass) + relu + pool1 ---
    cols1 = _pool_group_rows(_im2col_3x3(x))                               # (4, B*H1*W1, 9) bf16
    tr1 = _pick_tile(cols1.shape[1], tile_rows)
    s1, q1 = bn_stats(cols1, q["w1"], tr1)                                 # (1,64) sum / sumsq
    x1f = conv1_block(cols1, q["w1"], s1, q1, q["g1"], q["be1"], tr1)      # (B*H1*W1, 64) bf16
    x1 = x1f.reshape(B, H1, W1, 64)

    # --- layer 2 + fuse + upconv + head ---
    # TODO(synk): replace this im2col with in-kernel 3x3 tap accumulation over halo'd
    #             x1 tiles (manual DMA) to avoid the 9x HBM blowup at real image sizes.
    cols2 = _pool_group_rows(_im2col_3x3(x1))                              # (4, B*H2*W2, 576) bf16
    tr2 = _pick_tile(cols2.shape[1], tile_rows)
    s2, q2 = bn_stats(cols2, q["w2"], tr2)                                 # (1,128) sum / sumsq
    out = layer2_head_block(cols2, q["w2"], s2, q2, q["g2"], q["be2"],
                            q["wc1"], q["wc2"], q["bc"],
                            q["wt"], q["bu"], q["wdb"], q["bdb"], tr2)     # (B*H2*W2, 256)

    # --- glue: re-interleave the 4 upconv taps into the upsampled grid ---
    Hu, Wu = 2 * H2, 2 * W2
    heads = out.reshape(B, H2, W2, 4, 64)[..., :45]                        # (b, i, j, t, 45)
    pred = (heads.reshape(B, H2, W2, 2, 2, 45)                             # (b, i, j, dy, dx, c)
            .transpose(0, 1, 3, 2, 4, 5)                                   # (b, i, dy, j, dx, c)
            .reshape(B, Hu, Wu, 45))
    predictions = pred.reshape(B, Hu * Wu * 9, 5)   # == permute(0,2,3,1).reshape(B,-1,5)

    anchors = generate_anchors((H, W), (Hu, Wu))
    return anchors, predictions


# ----------------------------------------------------------------------------
# Deterministic synthetic parameters (shapes from the torch module __init__)
# conv biases b1/b2 are omitted: before train-mode BN they are exact no-ops.
# ----------------------------------------------------------------------------
def make_params(key):
    ks = jax.random.split(key, 14)
    n = lambda k, s, sc: (jax.random.normal(k, s, jnp.float32) * sc)
    return {
        # conv1: Conv2d(1, 64, 3, pad=1) as taps (9, 1, 64); bn1
        "w1": n(ks[0], (9, 1, 64), 0.30),
        "g1": 1.0 + 0.1 * jax.random.normal(ks[1], (1, 64), jnp.float32),
        "be1": n(ks[2], (1, 64), 0.10),
        # conv2: Conv2d(64, 128, 3, pad=1) as taps (9, 64, 128); bn2
        "w2": n(ks[3], (9, 64, 128), (64 * 9) ** -0.5),
        "g2": 1.0 + 0.1 * jax.random.normal(ks[4], (1, 128), jnp.float32),
        "be2": n(ks[5], (1, 128), 0.10),
        # concat_conv: Conv2d(192, 256, 1) split as (64,256) + (128,256)
        "wc1": n(ks[6], (64, 256), 192 ** -0.5),
        "wc2": n(ks[7], (128, 256), 192 ** -0.5),
        "bc": n(ks[8], (1, 256), 0.05),
        # upconv: ConvTranspose2d(256, 128, 2, stride=2) as taps (4, 256, 128), t = dy*2+dx
        "wu": n(ks[9], (4, 256, 128), 256 ** -0.5),
        "bu": n(ks[10], (1, 128), 0.05),
        # detection_head: Conv2d(128, 45, 1)
        "wd": n(ks[11], (128, 45), 128 ** -0.5),
        "bd": n(ks[12], (1, 45), 0.05),
    }


if __name__ == "__main__":
    key = jax.random.PRNGKey(0)
    k_x, k_p = jax.random.split(key)
    # input: grayscale image batch (B=2, C=1, H=16, W=16), NCHW as in the torch module
    x = jax.random.normal(k_x, (2, 1, 16, 16), jnp.float32)
    params = make_params(k_p)

    # tile_rows=16 is deliberately small so the multi-tile pipelined grid and the
    # cross-tile BN-stats accumulation are exercised even at these toy shapes
    # (production default is 512-row tiles).
    fwd = jax.jit(functools.partial(text_detection_forward, tile_rows=16))
    anchors, predictions = fwd(x, params)
    jax.block_until_ready((anchors, predictions))

    assert anchors.shape == (8 * 8 * 9, 4), anchors.shape
    assert predictions.shape == (2, 8 * 8 * 9, 5), predictions.shape
    assert bool(jnp.all(jnp.isfinite(anchors))) and bool(jnp.all(jnp.isfinite(predictions)))
    print("KERNEL_OK")
</pallas_src>

<mosaic_0001>
module attributes {stable_mosaic.version = 11 : i64} {
  func.func @_bn_stats_kernel(%arg0: i32, %arg1: memref<4x16x9xbf16, #tpu.memory_space<vmem>>, %arg2: memref<9x64xbf16, #tpu.memory_space<vmem>>, %arg3: memref<1x64xf32, #tpu.memory_space<vmem>>, %arg4: memref<1x64xf32, #tpu.memory_space<vmem>>) attributes {dimension_semantics = [#tpu.dimension_semantics<arbitrary>], iteration_bounds = array<i64: 8>, scalar_prefetch = 0 : i64, scratch_operands = 0 : i64, tpu.core_type = #tpu.core_type<tc>, window_params = [{transform_indices = @transform_0, window_bounds = array<i64: 4, 16, 9>}, {pipeline_mode = #tpu.pipeline_mode<synchronous>, transform_indices = @transform_1, window_bounds = array<i64: 9, 64>}, {pipeline_mode = #tpu.pipeline_mode<synchronous>, transform_indices = @transform_2, window_bounds = array<i64: 1, 64>}, {pipeline_mode = #tpu.pipeline_mode<synchronous>, transform_indices = @transform_3, window_bounds = array<i64: 1, 64>}]} {
    %c0_i32 = arith.constant 0 : i32
    %0 = arith.cmpi eq, %arg0, %c0_i32 : i32
    %1 = arith.extui %0 : i1 to i32
    %c0_i32_0 = arith.constant 0 : i32
    %2 = arith.cmpi ne, %1, %c0_i32_0 : i32
    scf.if %2 {
      %cst_15 = arith.constant 0.000000e+00 : f32
      %18 = vector.broadcast %cst_15 : f32 to vector<1x64xf32>
      %c0_16 = arith.constant 0 : index
      %c0_17 = arith.constant 0 : index
      %19 = vector.load %arg3[%c0_16, %c0_17] : memref<1x64xf32, #tpu.memory_space<vmem>>, vector<1x64xf32>
      tpu.vector_store %arg3[%c0_16, %c0_17], %18 {strides = array<i32>} : memref<1x64xf32, #tpu.memory_space<vmem>>, vector<1x64xf32>,
      %cst_18 = arith.constant 0.000000e+00 : f32
      %20 = vector.broadcast %cst_18 : f32 to vector<1x64xf32>
      %c0_19 = arith.constant 0 : index
      %c0_20 = arith.constant 0 : index
      %21 = vector.load %arg4[%c0_19, %c0_20] : memref<1x64xf32, #tpu.memory_space<vmem>>, vector<1x64xf32>
      tpu.vector_store %arg4[%c0_19, %c0_20], %20 {strides = array<i32>} : memref<1x64xf32, #tpu.memory_space<vmem>>, vector<1x64xf32>,
    } else {
    }
    %c0 = arith.constant 0 : index
    %c0_1 = arith.constant 0 : index
    %c0_2 = arith.constant 0 : index
    %3 = vector.load %arg1[%c0, %c0_1, %c0_2] : memref<4x16x9xbf16, #tpu.memory_space<vmem>>, vector<4x16x9xbf16>
    %4 = vector.shape_cast %3 : vector<4x16x9xbf16> to vector<64x9xbf16>
    %c0_3 = arith.constant 0 : index
    %c0_4 = arith.constant 0 : index
    %5 = vector.load %arg2[%c0_3, %c0_4] : memref<9x64xbf16, #tpu.memory_space<vmem>>, vector<9x64xbf16>
    %cst = arith.constant dense<0.000000e+00> : vector<64x64xf32>
    %6 = tpu.matmul %4, %5, %cst {dimension_numbers = #tpu.dot_dimension_numbers<[1], [0], [0], [1], [0, 0, 1, 1], [], []>} : vector<64x9xbf16>, vector<9x64xbf16>, vector<64x64xf32> -> vector<64x64xf32>
    %c0_5 = arith.constant 0 : index
    %c0_6 = arith.constant 0 : index
    %7 = vector.load %arg3[%c0_5, %c0_6] : memref<1x64xf32, #tpu.memory_space<vmem>>, vector<1x64xf32>
    %cst_7 = arith.constant dense<0.000000e+00> : vector<64xf32>
    %8 = vector.multi_reduction <add>, %6, %cst_7 [0] : vector<64x64xf32> to vector<64xf32>
    %9 = vector.shape_cast %8 : vector<64xf32> to vector<1x64xf32>
    %10 = arith.addf %7, %9 : vector<1x64xf32>
    %c0_8 = arith.constant 0 : index
    %c0_9 = arith.constant 0 : index
    %11 = vector.load %arg3[%c0_8, %c0_9] : memref<1x64xf32, #tpu.memory_space<vmem>>, vector<1x64xf32>
    tpu.vector_store %arg3[%c0_8, %c0_9], %10 {strides = array<i32>} : memref<1x64xf32, #tpu.memory_space<vmem>>, vector<1x64xf32>,
    %c0_10 = arith.constant 0 : index
    %c0_11 = arith.constant 0 : index
    %12 = vector.load %arg4[%c0_10, %c0_11] : memref<1x64xf32, #tpu.memory_space<vmem>>, vector<1x64xf32>
    %13 = arith.mulf %6, %6 : vector<64x64xf32>
    %cst_12 = arith.constant dense<0.000000e+00> : vector<64xf32>
    %14 = vector.multi_reduction <add>, %13, %cst_12 [0] : vector<64x64xf32> to vector<64xf32>
    %15 = vector.shape_cast %14 : vector<64xf32> to vector<1x64xf32>
    %16 = arith.addf %12, %15 : vector<1x64xf32>
    %c0_13 = arith.constant 0 : index
    %c0_14 = arith.constant 0 : index
    %17 = vector.load %arg4[%c0_13, %c0_14] : memref<1x64xf32, #tpu.memory_space<vmem>>, vector<1x64xf32>
    tpu.vector_store %arg4[%c0_13, %c0_14], %16 {strides = array<i32>} : memref<1x64xf32, #tpu.memory_space<vmem>>, vector<1x64xf32>,
    return
  }
  func.func @transform_0(%arg0: i32) -> (i32, i32, i32) {
    %c0_i32 = arith.constant 0 : i32
    %c0_i32_0 = arith.constant 0 : i32
    %c0_i32_1 = arith.constant 0 : i32
    return %c0_i32, %arg0, %c0_i32_0 : i32, i32, i32
  }
  func.func @transform_1(%arg0: i32) -> (i32, i32) {
    %c0_i32 = arith.constant 0 : i32
    %c0_i32_0 = arith.constant 0 : i32
    %c0_i32_1 = arith.constant 0 : i32
    return %c0_i32, %c0_i32_0 : i32, i32
  }
  func.func @transform_2(%arg0: i32) -> (i32, i32) {
    %c0_i32 = arith.constant 0 : i32
    %c0_i32_0 = arith.constant 0 : i32
    %c0_i32_1 = arith.constant 0 : i32
    return %c0_i32, %c0_i32_0 : i32, i32
  }
  func.func @transform_3(%arg0: i32) -> (i32, i32) {
    %c0_i32 = arith.constant 0 : i32
    %c0_i32_0 = arith.constant 0 : i32
    %c0_i32_1 = arith.constant 0 : i32
    return %c0_i32, %c0_i32_0 : i32, i32
  }
}

module attributes {stable_mosaic.version = 11 : i64} {
  func.func @_conv1_bn_relu_pool_kernel(%arg0: i32, %arg1: memref<4x16x9xbf16, #tpu.memory_space<vmem>>, %arg2: memref<9x64xbf16, #tpu.memory_space<vmem>>, %arg3: memref<1x64xf32, #tpu.memory_space<vmem>>, %arg4: memref<1x64xf32, #tpu.memory_space<vmem>>, %arg5: memref<1x64xf32, #tpu.memory_space<vmem>>, %arg6: memref<1x64xf32, #tpu.memory_space<vmem>>, %arg7: memref<16x64xbf16, #tpu.memory_space<vmem>>) attributes {dimension_semantics = [#tpu.dimension_semantics<parallel>], iteration_bounds = array<i64: 8>, scalar_prefetch = 0 : i64, scratch_operands = 0 : i64, tpu.core_type = #tpu.core_type<tc>, window_params = [{transform_indices = @transform_0, window_bounds = array<i64: 4, 16, 9>}, {pipeline_mode = #tpu.pipeline_mode<synchronous>, transform_indices = @transform_1, window_bounds = array<i64: 9, 64>}, {pipeline_mode = #tpu.pipeline_mode<synchronous>, transform_indices = @transform_2, window_bounds = array<i64: 1, 64>}, {pipeline_mode = #tpu.pipeline_mode<synchronous>, transform_indices = @transform_3, window_bounds = array<i64: 1, 64>}, {pipeline_mode = #tpu.pipeline_mode<synchronous>, transform_indices = @transform_4, window_bounds = array<i64: 1, 64>}, {pipeline_mode = #tpu.pipeline_mode<synchronous>, transform_indices = @transform_5, window_bounds = array<i64: 1, 64>}, {transform_indices = @transform_6, window_bounds = array<i64: 16, 64>}]} {
    %c0 = arith.constant 0 : index
    %c0_0 = arith.constant 0 : index
    %c0_1 = arith.constant 0 : index
    %0 = vector.load %arg1[%c0, %c0_0, %c0_1] : memref<4x16x9xbf16, #tpu.memory_space<vmem>>, vector<4x16x9xbf16>
    %1 = vector.shape_cast %0 : vector<4x16x9xbf16> to vector<64x9xbf16>
    %c0_2 = arith.constant 0 : index
    %c0_3 = arith.constant 0 : index
    %2 = vector.load %arg2[%c0_2, %c0_3] : memref<9x64xbf16, #tpu.memory_space<vmem>>, vector<9x64xbf16>
    %cst = arith.constant dense<0.000000e+00> : vector<64x64xf32>
    %3 = tpu.matmul %1, %2, %cst {dimension_numbers = #tpu.dot_dimension_numbers<[1], [0], [0], [1], [0, 0, 1, 1], [], []>} : vector<64x9xbf16>, vector<9x64xbf16>, vector<64x64xf32> -> vector<64x64xf32>
    %c0_4 = arith.constant 0 : index
    %c0_5 = arith.constant 0 : index
    %4 = vector.load %arg3[%c0_4, %c0_5] : memref<1x64xf32, #tpu.memory_space<vmem>>, vector<1x64xf32>
    %cst_6 = arith.constant 0.001953125 : f32
    %5 = vector.broadcast %cst_6 : f32 to vector<1x64xf32>
    %6 = arith.mulf %4, %5 : vector<1x64xf32>
    %c0_7 = arith.constant 0 : index
    %c0_8 = arith.constant 0 : index
    %7 = vector.load %arg4[%c0_7, %c0_8] : memref<1x64xf32, #tpu.memory_space<vmem>>, vector<1x64xf32>
    %cst_9 = arith.constant 0.001953125 : f32
    %8 = vector.broadcast %cst_9 : f32 to vector<1x64xf32>
    %9 = arith.mulf %7, %8 : vector<1x64xf32>
    %10 = arith.mulf %6, %6 : vector<1x64xf32>
    %11 = arith.subf %9, %10 : vector<1x64xf32>
    %cst_10 = arith.constant 0.000000e+00 : f32
    %12 = vector.broadcast %cst_10 : f32 to vector<1x64xf32>
    %13 = arith.maximumf %11, %12 : vector<1x64xf32>
    %c0_11 = arith.constant 0 : index
    %c0_12 = arith.constant 0 : index
    %14 = vector.load %arg5[%c0_11, %c0_12] : memref<1x64xf32, #tpu.memory_space<vmem>>, vector<1x64xf32>
    %cst_13 = arith.constant 9.99999974E-6 : f32
    %15 = vector.broadcast %cst_13 : f32 to vector<1x64xf32>
    %16 = arith.addf %13, %15 : vector<1x64xf32>
    %17 = math.rsqrt %16 : vector<1x64xf32>
    %18 = arith.mulf %14, %17 : vector<1x64xf32>
    %c0_14 = arith.constant 0 : index
    %c0_15 = arith.constant 0 : index
    %19 = vector.load %arg6[%c0_14, %c0_15] : memref<1x64xf32, #tpu.memory_space<vmem>>, vector<1x64xf32>
    %20 = arith.mulf %6, %18 : vector<1x64xf32>
    %21 = arith.subf %19, %20 : vector<1x64xf32>
    %22 = vector.broadcast %18 : vector<1x64xf32> to vector<64x64xf32>
    %23 = arith.mulf %3, %22 : vector<64x64xf32>
    %24 = vector.broadcast %21 : vector<1x64xf32> to vector<64x64xf32>
    %25 = arith.addf %23, %24 : vector<64x64xf32>
    %cst_16 = arith.constant 0.000000e+00 : f32
    %26 = vector.broadcast %cst_16 : f32 to vector<64x64xf32>
    %27 = arith.maximumf %25, %26 : vector<64x64xf32>
    %28 = vector.extract_strided_slice %27 {offsets = [0, 0], sizes = [16, 64], strides = [1, 1]} : vector<64x64xf32> to vector<16x64xf32>
    %29 = vector.extract_strided_slice %27 {offsets = [16, 0], sizes = [16, 64], strides = [1, 1]} : vector<64x64xf32> to vector<16x64xf32>
    %30 = arith.maximumf %28, %29 : vector<16x64xf32>
    %31 = vector.extract_strided_slice %27 {offsets = [32, 0], sizes = [16, 64], strides = [1, 1]} : vector<64x64xf32> to vector<16x64xf32>
    %32 = vector.extract_strided_slice %27 {offsets = [48, 0], sizes = [16, 64], strides = [1, 1]} : vector<64x64xf32> to vector<16x64xf32>
    %33 = arith.maximumf %31, %32 : vector<16x64xf32>
    %34 = arith.maximumf %30, %33 : vector<16x64xf32>
    %35 = arith.truncf %34 : vector<16x64xf32> to vector<16x64xbf16>
    %c0_17 = arith.constant 0 : index
    %c0_18 = arith.constant 0 : index
    %36 = vector.load %arg7[%c0_17, %c0_18] : memref<16x64xbf16, #tpu.memory_space<vmem>>, vector<16x64xbf16>
    tpu.vector_store %arg7[%c0_17, %c0_18], %35 {strides = array<i32>} : memref<16x64xbf16, #tpu.memory_space<vmem>>, vector<16x64xbf16>,
    return
  }
  func.func @transform_0(%arg0: i32) -> (i32, i32, i32) {
    %c0_i32 = arith.constant 0 : i32
    %c0_i32_0 = arith.constant 0 : i32
    %c0_i32_1 = arith.constant 0 : i32
    return %c0_i32, %arg0, %c0_i32_0 : i32, i32, i32
  }
  func.func @transform_1(%arg0: i32) -> (i32, i32) {
    %c0_i32 = arith.constant 0 : i32
    %c0_i32_0 = arith.constant 0 : i32
    %c0_i32_1 = arith.constant 0 : i32
    return %c0_i32, %c0_i32_0 : i32, i32
  }
  func.func @transform_2(%arg0: i32) -> (i32, i32) {
    %c0_i32 = arith.constant 0 : i32
    %c0_i32_0 = arith.constant 0 : i32
    %c0_i32_1 = arith.constant 0 : i32
    return %c0_i32, %c0_i32_0 : i32, i32
  }
  func.func @transform_3(%arg0: i32) -> (i32, i32) {
    %c0_i32 = arith.constant 0 : i32
    %c0_i32_0 = arith.constant 0 : i32
    %c0_i32_1 = arith.constant 0 : i32
    return %c0_i32, %c0_i32_0 : i32, i32
  }
  func.func @transform_4(%arg0: i32) -> (i32, i32) {
    %c0_i32 = arith.constant 0 : i32
    %c0_i32_0 = arith.constant 0 : i32
    %c0_i32_1 = arith.constant 0 : i32
    return %c0_i32, %c0_i32_0 : i32, i32
  }
  func.func @transform_5(%arg0: i32) -> (i32, i32) {
    %c0_i32 = arith.constant 0 : i32
    %c0_i32_0 = arith.constant 0 : i32
    %c0_i32_1 = arith.constant 0 : i32
    return %c0_i32, %c0_i32_0 : i32, i32
  }
  func.func @transform_6(%arg0: i32) -> (i32, i32) {
    %c0_i32 = arith.constant 0 : i32
    %c0_i32_0 = arith.constant 0 : i32
    return %arg0, %c0_i32 : i32, i32
  }
}

module attributes {stable_mosaic.version = 11 : i64} {
  func.func @_bn_stats_kernel(%arg0: i32, %arg1: memref<4x16x576xbf16, #tpu.memory_space<vmem>>, %arg2: memref<576x128xbf16, #tpu.memory_space<vmem>>, %arg3: memref<1x128xf32, #tpu.memory_space<vmem>>, %arg4: memref<1x128xf32, #tpu.memory_space<vmem>>) attributes {dimension_semantics = [#tpu.dimension_semantics<arbitrary>], iteration_bounds = array<i64: 2>, scalar_prefetch = 0 : i64, scratch_operands = 0 : i64, tpu.core_type = #tpu.core_type<tc>, window_params = [{transform_indices = @transform_0, window_bounds = array<i64: 4, 16, 576>}, {pipeline_mode = #tpu.pipeline_mode<synchronous>, transform_indices = @transform_1, window_bounds = array<i64: 576, 128>}, {pipeline_mode = #tpu.pipeline_mode<synchronous>, transform_indices = @transform_2, window_bounds = array<i64: 1, 128>}, {pipeline_mode = #tpu.pipeline_mode<synchronous>, transform_indices = @transform_3, window_bounds = array<i64: 1, 128>}]} {
    %c0_i32 = arith.constant 0 : i32
    %0 = arith.cmpi eq, %arg0, %c0_i32 : i32
    %1 = arith.extui %0 : i1 to i32
    %c0_i32_0 = arith.constant 0 : i32
    %2 = arith.cmpi ne, %1, %c0_i32_0 : i32
    scf.if %2 {
      %cst_15 = arith.constant 0.000000e+00 : f32
      %18 = vector.broadcast %cst_15 : f32 to vector<1x128xf32>
      %c0_16 = arith.constant 0 : index
      %c0_17 = arith.constant 0 : index
      %19 = vector.load %arg3[%c0_16, %c0_17] : memref<1x128xf32, #tpu.memory_space<vmem>>, vector<1x128xf32>
      tpu.vector_store %arg3[%c0_16, %c0_17], %18 {strides = array<i32>} : memref<1x128xf32, #tpu.memory_space<vmem>>, vector<1x128xf32>,
      %cst_18 = arith.constant 0.000000e+00 : f32
      %20 = vector.broadcast %cst_18 : f32 to vector<1x128xf32>
      %c0_19 = arith.constant 0 : index
      %c0_20 = arith.constant 0 : index
      %21 = vector.load %arg4[%c0_19, %c0_20] : memref<1x128xf32, #tpu.memory_space<vmem>>, vector<1x128xf32>
      tpu.vector_store %arg4[%c0_19, %c0_20], %20 {strides = array<i32>} : memref<1x128xf32, #tpu.memory_space<vmem>>, vector<1x128xf32>,
    } else {
    }
    %c0 = arith.constant 0 : index
    %c0_1 = arith.constant 0 : index
    %c0_2 = arith.constant 0 : index
    %3 = vector.load %arg1[%c0, %c0_1, %c0_2] : memref<4x16x576xbf16, #tpu.memory_space<vmem>>, vector<4x16x576xbf16>
    %4 = vector.shape_cast %3 : vector<4x16x576xbf16> to vector<64x576xbf16>
    %c0_3 = arith.constant 0 : index
    %c0_4 = arith.constant 0 : index
    %5 = vector.load %arg2[%c0_3, %c0_4] : memref<576x128xbf16, #tpu.memory_space<vmem>>, vector<576x128xbf16>
    %cst = arith.constant dense<0.000000e+00> : vector<64x128xf32>
    %6 = tpu.matmul %4, %5, %cst {dimension_numbers = #tpu.dot_dimension_numbers<[1], [0], [0], [1], [0, 0, 1, 1], [], []>} : vector<64x576xbf16>, vector<576x128xbf16>, vector<64x128xf32> -> vector<64x128xf32>
    %c0_5 = arith.constant 0 : index
    %c0_6 = arith.constant 0 : index
    %7 = vector.load %arg3[%c0_5, %c0_6] : memref<1x128xf32, #tpu.memory_space<vmem>>, vector<1x128xf32>
    %cst_7 = arith.constant dense<0.000000e+00> : vector<128xf32>
    %8 = vector.multi_reduction <add>, %6, %cst_7 [0] : vector<64x128xf32> to vector<128xf32>
    %9 = vector.shape_cast %8 : vector<128xf32> to vector<1x128xf32>
    %10 = arith.addf %7, %9 : vector<1x128xf32>
    %c0_8 = arith.constant 0 : index
    %c0_9 = arith.constant 0 : index
    %11 = vector.load %arg3[%c0_8, %c0_9] : memref<1x128xf32, #tpu.memory_space<vmem>>, vector<1x128xf32>
    tpu.vector_store %arg3[%c0_8, %c0_9], %10 {strides = array<i32>} : memref<1x128xf32, #tpu.memory_space<vmem>>, vector<1x128xf32>,
    %c0_10 = arith.constant 0 : index
    %c0_11 = arith.constant 0 : index
    %12 = vector.load %arg4[%c0_10, %c0_11] : memref<1x128xf32, #tpu.memory_space<vmem>>, vector<1x128xf32>
    %13 = arith.mulf %6, %6 : vector<64x128xf32>
    %cst_12 = arith.constant dense<0.000000e+00> : vector<128xf32>
    %14 = vector.multi_reduction <add>, %13, %cst_12 [0] : vector<64x128xf32> to vector<128xf32>
    %15 = vector.shape_cast %14 : vector<128xf32> to vector<1x128xf32>
    %16 = arith.addf %12, %15 : vector<1x128xf32>
    %c0_13 = arith.constant 0 : index
    %c0_14 = arith.constant 0 : index
    %17 = vector.load %arg4[%c0_13, %c0_14] : memref<1x128xf32, #tpu.memory_space<vmem>>, vector<1x128xf32>
    tpu.vector_store %arg4[%c0_13, %c0_14], %16 {strides = array<i32>} : memref<1x128xf32, #tpu.memory_space<vmem>>, vector<1x128xf32>,
    return
  }
  func.func @transform_0(%arg0: i32) -> (i32, i32, i32) {
    %c0_i32 = arith.constant 0 : i32
    %c0_i32_0 = arith.constant 0 : i32
    %c0_i32_1 = arith.constant 0 : i32
    return %c0_i32, %arg0, %c0_i32_0 : i32, i32, i32
  }
  func.func @transform_1(%arg0: i32) -> (i32, i32) {
    %c0_i32 = arith.constant 0 : i32
    %c0_i32_0 = arith.constant 0 : i32
    %c0_i32_1 = arith.constant 0 : i32
    return %c0_i32, %c0_i32_0 : i32, i32
  }
  func.func @transform_2(%arg0: i32) -> (i32, i32) {
    %c0_i32 = arith.constant 0 : i32
    %c0_i32_0 = arith.constant 0 : i32
    %c0_i32_1 = arith.constant 0 : i32
    return %c0_i32, %c0_i32_0 : i32, i32
  }
  func.func @transform_3(%arg0: i32) -> (i32, i32) {
    %c0_i32 = arith.constant 0 : i32
    %c0_i32_0 = arith.constant 0 : i32
    %c0_i32_1 = arith.constant 0 : i32
    return %c0_i32, %c0_i32_0 : i32, i32
  }
}

module attributes {stable_mosaic.version = 11 : i64} {
  func.func @_layer2_head_kernel(%arg0: i32, %arg1: memref<4x16x576xbf16, #tpu.memory_space<vmem>>, %arg2: memref<576x128xbf16, #tpu.memory_space<vmem>>, %arg3: memref<1x128xf32, #tpu.memory_space<vmem>>, %arg4: memref<1x128xf32, #tpu.memory_space<vmem>>, %arg5: memref<1x128xf32, #tpu.memory_space<vmem>>, %arg6: memref<1x128xf32, #tpu.memory_space<vmem>>, %arg7: memref<64x256xbf16, #tpu.memory_space<vmem>>, %arg8: memref<128x256xbf16, #tpu.memory_space<vmem>>, %arg9: memref<1x256xf32, #tpu.memory_space<vmem>>, %arg10: memref<256x512xbf16, #tpu.memory_space<vmem>>, %arg11: memref<1x512xf32, #tpu.memory_space<vmem>>, %arg12: memref<512x256xbf16, #tpu.memory_space<vmem>>, %arg13: memref<1x256xf32, #tpu.memory_space<vmem>>, %arg14: memref<16x256xf32, #tpu.memory_space<vmem>>) attributes {dimension_semantics = [#tpu.dimension_semantics<parallel>], iteration_bounds = array<i64: 2>, scalar_prefetch = 0 : i64, scratch_operands = 0 : i64, tpu.core_type = #tpu.core_type<tc>, window_params = [{transform_indices = @transform_0, window_bounds = array<i64: 4, 16, 576>}, {pipeline_mode = #tpu.pipeline_mode<synchronous>, transform_indices = @transform_1, window_bounds = array<i64: 576, 128>}, {pipeline_mode = #tpu.pipeline_mode<synchronous>, transform_indices = @transform_2, window_bounds = array<i64: 1, 128>}, {pipeline_mode = #tpu.pipeline_mode<synchronous>, transform_indices = @transform_3, window_bounds = array<i64: 1, 128>}, {pipeline_mode = #tpu.pipeline_mode<synchronous>, transform_indices = @transform_4, window_bounds = array<i64: 1, 128>}, {pipeline_mode = #tpu.pipeline_mode<synchronous>, transform_indices = @transform_5, window_bounds = array<i64: 1, 128>}, {pipeline_mode = #tpu.pipeline_mode<synchronous>, transform_indices = @transform_6, window_bounds = array<i64: 64, 256>}, {pipeline_mode = #tpu.pipeline_mode<synchronous>, transform_indices = @transform_7, window_bounds = array<i64: 128, 256>}, {pipeline_mode = #tpu.pipeline_mode<synchronous>, transform_indices = @transform_8, window_bounds = array<i64: 1, 256>}, {pipeline_mode = #tpu.pipeline_mode<synchronous>, transform_indices = @transform_9, window_bounds = array<i64: 256, 512>}, {pipeline_mode = #tpu.pipeline_mode<synchronous>, transform_indices = @transform_10, window_bounds = array<i64: 1, 512>}, {pipeline_mode = #tpu.pipeline_mode<synchronous>, transform_indices = @transform_11, window_bounds = array<i64: 512, 256>}, {pipeline_mode = #tpu.pipeline_mode<synchronous>, transform_indices = @transform_12, window_bounds = array<i64: 1, 256>}, {transform_indices = @transform_13, window_bounds = array<i64: 16, 256>}]} {
    %c0 = arith.constant 0 : index
    %c0_0 = arith.constant 0 : index
    %c0_1 = arith.constant 0 : index
    %0 = vector.load %arg1[%c0, %c0_0, %c0_1] : memref<4x16x576xbf16, #tpu.memory_space<vmem>>, vector<4x16x576xbf16>
    %1 = vector.shape_cast %0 : vector<4x16x576xbf16> to vector<64x576xbf16>
    %c0_2 = arith.constant 0 : index
    %c0_3 = arith.constant 0 : index
    %2 = vector.load %arg2[%c0_2, %c0_3] : memref<576x128xbf16, #tpu.memory_space<vmem>>, vector<576x128xbf16>
    %cst = arith.constant dense<0.000000e+00> : vector<64x128xf32>
    %3 = tpu.matmul %1, %2, %cst {dimension_numbers = #tpu.dot_dimension_numbers<[1], [0], [0], [1], [0, 0, 1, 1], [], []>} : vector<64x576xbf16>, vector<576x128xbf16>, vector<64x128xf32> -> vector<64x128xf32>
    %c0_4 = arith.constant 0 : index
    %c0_5 = arith.constant 0 : index
    %4 = vector.load %arg3[%c0_4, %c0_5] : memref<1x128xf32, #tpu.memory_space<vmem>>, vector<1x128xf32>
    %cst_6 = arith.constant 7.812500e-03 : f32
    %5 = vector.broadcast %cst_6 : f32 to vector<1x128xf32>
    %6 = arith.mulf %4, %5 : vector<1x128xf32>
    %c0_7 = arith.constant 0 : index
    %c0_8 = arith.constant 0 : index
    %7 = vector.load %arg4[%c0_7, %c0_8] : memref<1x128xf32, #tpu.memory_space<vmem>>, vector<1x128xf32>
    %cst_9 = arith.constant 7.812500e-03 : f32
    %8 = vector.broadcast %cst_9 : f32 to vector<1x128xf32>
    %9 = arith.mulf %7, %8 : vector<1x128xf32>
    %10 = arith.mulf %6, %6 : vector<1x128xf32>
    %11 = arith.subf %9, %10 : vector<1x128xf32>
    %cst_10 = arith.constant 0.000000e+00 : f32
    %12 = vector.broadcast %cst_10 : f32 to vector<1x128xf32>
    %13 = arith.maximumf %11, %12 : vector<1x128xf32>
    %c0_11 = arith.constant 0 : index
    %c0_12 = arith.constant 0 : index
    %14 = vector.load %arg5[%c0_11, %c0_12] : memref<1x128xf32, #tpu.memory_space<vmem>>, vector<1x128xf32>
    %cst_13 = arith.constant 9.99999974E-6 : f32
    %15 = vector.broadcast %cst_13 : f32 to vector<1x128xf32>
    %16 = arith.addf %13, %15 : vector<1x128xf32>
    %17 = math.rsqrt %16 : vector<1x128xf32>
    %18 = arith.mulf %14, %17 : vector<1x128xf32>
    %c0_14 = arith.constant 0 : index
    %c0_15 = arith.constant 0 : index
    %19 = vector.load %arg6[%c0_14, %c0_15] : memref<1x128xf32, #tpu.memory_space<vmem>>, vector<1x128xf32>
    %20 = arith.mulf %6, %18 : vector<1x128xf32>
    %21 = arith.subf %19, %20 : vector<1x128xf32>
    %22 = vector.broadcast %18 : vector<1x128xf32> to vector<64x128xf32>
    %23 = arith.mulf %3, %22 : vector<64x128xf32>
    %24 = vector.broadcast %21 : vector<1x128xf32> to vector<64x128xf32>
    %25 = arith.addf %23, %24 : vector<64x128xf32>
    %cst_16 = arith.constant 0.000000e+00 : f32
    %26 = vector.broadcast %cst_16 : f32 to vector<64x128xf32>
    %27 = arith.maximumf %25, %26 : vector<64x128xf32>
    %28 = vector.extract_strided_slice %27 {offsets = [0, 0], sizes = [16, 128], strides = [1, 1]} : vector<64x128xf32> to vector<16x128xf32>
    %29 = vector.extract_strided_slice %27 {offsets = [16, 0], sizes = [16, 128], strides = [1, 1]} : vector<64x128xf32> to vector<16x128xf32>
    %30 = arith.maximumf %28, %29 : vector<16x128xf32>
    %31 = vector.extract_strided_slice %27 {offsets = [32, 0], sizes = [16, 128], strides = [1, 1]} : vector<64x128xf32> to vector<16x128xf32>
    %32 = vector.extract_strided_slice %27 {offsets = [48, 0], sizes = [16, 128], strides = [1, 1]} : vector<64x128xf32> to vector<16x128xf32>
    %33 = arith.maximumf %31, %32 : vector<16x128xf32>
    %34 = arith.maximumf %30, %33 : vector<16x128xf32>
    %35 = vector.extract_strided_slice %0 {offsets = [0, 0, 256], sizes = [1, 16, 64], strides = [1, 1, 1]} : vector<4x16x576xbf16> to vector<1x16x64xbf16>
    %36 = vector.shape_cast %35 : vector<1x16x64xbf16> to vector<16x64xbf16>
    %37 = arith.extf %36 : vector<16x64xbf16> to vector<16x64xf32>
    %38 = vector.extract_strided_slice %0 {offsets = [1, 0, 256], sizes = [1, 16, 64], strides = [1, 1, 1]} : vector<4x16x576xbf16> to vector<1x16x64xbf16>
    %39 = vector.shape_cast %38 : vector<1x16x64xbf16> to vector<16x64xbf16>
    %40 = arith.extf %39 : vector<16x64xbf16> to vector<16x64xf32>
    %41 = arith.addf %37, %40 : vector<16x64xf32>
    %42 = vector.extract_strided_slice %0 {offsets = [2, 0, 256], sizes = [1, 16, 64], strides = [1, 1, 1]} : vector<4x16x576xbf16> to vector<1x16x64xbf16>
    %43 = vector.shape_cast %42 : vector<1x16x64xbf16> to vector<16x64xbf16>
    %44 = arith.extf %43 : vector<16x64xbf16> to vector<16x64xf32>
    %45 = arith.addf %41, %44 : vector<16x64xf32>
    %46 = vector.extract_strided_slice %0 {offsets = [3, 0, 256], sizes = [1, 16, 64], strides = [1, 1, 1]} : vector<4x16x576xbf16> to vector<1x16x64xbf16>
    %47 = vector.shape_cast %46 : vector<1x16x64xbf16> to vector<16x64xbf16>
    %48 = arith.extf %47 : vector<16x64xbf16> to vector<16x64xf32>
    %49 = arith.addf %45, %48 : vector<16x64xf32>
    %cst_17 = arith.constant 2.500000e-01 : f32
    %50 = vector.broadcast %cst_17 : f32 to vector<16x64xf32>
    %51 = arith.mulf %50, %49 : vector<16x64xf32>
    %52 = arith.truncf %51 : vector<16x64xf32> to vector<16x64xbf16>
    %c0_18 = arith.constant 0 : index
    %c0_19 = arith.constant 0 : index
    %53 = vector.load %arg7[%c0_18, %c0_19] : memref<64x256xbf16, #tpu.memory_space<vmem>>, vector<64x256xbf16>
    %cst_20 = arith.constant dense<0.000000e+00> : vector<16x256xf32>
    %54 = tpu.matmul %52, %53, %cst_20 {dimension_numbers = #tpu.dot_dimension_numbers<[1], [0], [0], [1], [0, 0, 1, 1], [], []>} : vector<16x64xbf16>, vector<64x256xbf16>, vector<16x256xf32> -> vector<16x256xf32>
    %55 = arith.truncf %34 : vector<16x128xf32> to vector<16x128xbf16>
    %c0_21 = arith.constant 0 : index
    %c0_22 = arith.constant 0 : index
    %56 = vector.load %arg8[%c0_21, %c0_22] : memref<128x256xbf16, #tpu.memory_space<vmem>>, vector<128x256xbf16>
    %cst_23 = arith.constant dense<0.000000e+00> : vector<16x256xf32>
    %57 = tpu.matmul %55, %56, %cst_23 {dimension_numbers = #tpu.dot_dimension_numbers<[1], [0], [0], [1], [0, 0, 1, 1], [], []>} : vector<16x128xbf16>, vector<128x256xbf16>, vector<16x256xf32> -> vector<16x256xf32>
    %58 = arith.addf %54, %57 : vector<16x256xf32>
    %c0_24 = arith.constant 0 : index
    %c0_25 = arith.constant 0 : index
    %59 = vector.load %arg9[%c0_24, %c0_25] : memref<1x256xf32, #tpu.memory_space<vmem>>, vector<1x256xf32>
    %60 = vector.broadcast %59 : vector<1x256xf32> to vector<16x256xf32>
    %61 = arith.addf %58, %60 : vector<16x256xf32>
    %cst_26 = arith.constant 0.000000e+00 : f32
    %62 = vector.broadcast %cst_26 : f32 to vector<16x256xf32>
    %63 = arith.maximumf %61, %62 : vector<16x256xf32>
    %64 = arith.truncf %63 : vector<16x256xf32> to vector<16x256xbf16>
    %c0_27 = arith.constant 0 : index
    %c0_28 = arith.constant 0 : index
    %65 = vector.load %arg10[%c0_27, %c0_28] : memref<256x512xbf16, #tpu.memory_space<vmem>>, vector<256x512xbf16>
    %cst_29 = arith.constant dense<0.000000e+00> : vector<16x512xf32>
    %66 = tpu.matmul %64, %65, %cst_29 {dimension_numbers = #tpu.dot_dimension_numbers<[1], [0], [0], [1], [0, 0, 1, 1], [], []>} : vector<16x256xbf16>, vector<256x512xbf16>, vector<16x512xf32> -> vector<16x512xf32>
    %c0_30 = arith.constant 0 : index
    %c0_31 = arith.constant 0 : index
    %67 = vector.load %arg11[%c0_30, %c0_31] : memref<1x512xf32, #tpu.memory_space<vmem>>, vector<1x512xf32>
    %68 = vector.broadcast %67 : vector<1x512xf32> to vector<16x512xf32>
    %69 = arith.addf %66, %68 : vector<16x512xf32>
    %cst_32 = arith.constant 0.000000e+00 : f32
    %70 = vector.broadcast %cst_32 : f32 to vector<16x512xf32>
    %71 = arith.maximumf %69, %70 : vector<16x512xf32>
    %72 = arith.truncf %71 : vector<16x512xf32> to vector<16x512xbf16>
    %c0_33 = arith.constant 0 : index
    %c0_34 = arith.constant 0 : index
    %73 = vector.load %arg12[%c0_33, %c0_34] : memref<512x256xbf16, #tpu.memory_space<vmem>>, vector<512x256xbf16>
    %cst_35 = arith.constant dense<0.000000e+00> : vector<16x256xf32>
    %74 = tpu.matmul %72, %73, %cst_35 {dimension_numbers = #tpu.dot_dimension_numbers<[1], [0], [0], [1], [0, 0, 1, 1], [], []>} : vector<16x512xbf16>, vector<512x256xbf16>, vector<16x256xf32> -> vector<16x256xf32>
    %c0_36 = arith.constant 0 : index
    %c0_37 = arith.constant 0 : index
    %75 = vector.load %arg13[%c0_36, %c0_37] : memref<1x256xf32, #tpu.memory_space<vmem>>, vector<1x256xf32>
    %76 = vector.broadcast %75 : vector<1x256xf32> to vector<16x256xf32>
    %77 = arith.addf %74, %76 : vector<16x256xf32>
    %c0_38 = arith.constant 0 : index
    %c0_39 = arith.constant 0 : index
    %78 = vector.load %arg14[%c0_38, %c0_39] : memref<16x256xf32, #tpu.memory_space<vmem>>, vector<16x256xf32>
    tpu.vector_store %arg14[%c0_38, %c0_39], %77 {strides = array<i32>} : memref<16x256xf32, #tpu.memory_space<vmem>>, vector<16x256xf32>,
    return
  }
  func.func @transform_0(%arg0: i32) -> (i32, i32, i32) {
    %c0_i32 = arith.constant 0 : i32
    %c0_i32_0 = arith.constant 0 : i32
    %c0_i32_1 = arith.constant 0 : i32
    return %c0_i32, %arg0, %c0_i32_0 : i32, i32, i32
  }
  func.func @transform_1(%arg0: i32) -> (i32, i32) {
    %c0_i32 = arith.constant 0 : i32
    %c0_i32_0 = arith.constant 0 : i32
    %c0_i32_1 = arith.constant 0 : i32
    return %c0_i32, %c0_i32_0 : i32, i32
  }
  func.func @transform_2(%arg0: i32) -> (i32, i32) {
    %c0_i32 = arith.constant 0 : i32
    %c0_i32_0 = arith.constant 0 : i32
    %c0_i32_1 = arith.constant 0 : i32
    return %c0_i32, %c0_i32_0 : i32, i32
  }
  func.func @transform_3(%arg0: i32) -> (i32, i32) {
    %c0_i32 = arith.constant 0 : i32
    %c0_i32_0 = arith.constant 0 : i32
    %c0_i32_1 = arith.constant 0 : i32
    return %c0_i32, %c0_i32_0 : i32, i32
  }
  func.func @transform_4(%arg0: i32) -> (i32, i32) {
    %c0_i32 = arith.constant 0 : i32
    %c0_i32_0 = arith.constant 0 : i32
    %c0_i32_1 = arith.constant 0 : i32
    return %c0_i32, %c0_i32_0 : i32, i32
  }
  func.func @transform_5(%arg0: i32) -> (i32, i32) {
    %c0_i32 = arith.constant 0 : i32
    %c0_i32_0 = arith.constant 0 : i32
    %c0_i32_1 = arith.constant 0 : i32
    return %c0_i32, %c0_i32_0 : i32, i32
  }
  func.func @transform_6(%arg0: i32) -> (i32, i32) {
    %c0_i32 = arith.constant 0 : i32
    %c0_i32_0 = arith.constant 0 : i32
    %c0_i32_1 = arith.constant 0 : i32
    return %c0_i32, %c0_i32_0 : i32, i32
  }
  func.func @transform_7(%arg0: i32) -> (i32, i32) {
    %c0_i32 = arith.constant 0 : i32
    %c0_i32_0 = arith.constant 0 : i32
    %c0_i32_1 = arith.constant 0 : i32
    return %c0_i32, %c0_i32_0 : i32, i32
  }
  func.func @transform_8(%arg0: i32) -> (i32, i32) {
    %c0_i32 = arith.constant 0 : i32
    %c0_i32_0 = arith.constant 0 : i32
    %c0_i32_1 = arith.constant 0 : i32
    return %c0_i32, %c0_i32_0 : i32, i32
  }
  func.func @transform_9(%arg0: i32) -> (i32, i32) {
    %c0_i32 = arith.constant 0 : i32
    %c0_i32_0 = arith.constant 0 : i32
    %c0_i32_1 = arith.constant 0 : i32
    return %c0_i32, %c0_i32_0 : i32, i32
  }
  func.func @transform_10(%arg0: i32) -> (i32, i32) {
    %c0_i32 = arith.constant 0 : i32
    %c0_i32_0 = arith.constant 0 : i32
    %c0_i32_1 = arith.constant 0 : i32
    return %c0_i32, %c0_i32_0 : i32, i32
  }
  func.func @transform_11(%arg0: i32) -> (i32, i32) {
    %c0_i32 = arith.constant 0 : i32
    %c0_i32_0 = arith.constant 0 : i32
    %c0_i32_1 = arith.constant 0 : i32
    return %c0_i32, %c0_i32_0 : i32, i32
  }
  func.func @transform_12(%arg0: i32) -> (i32, i32) {
    %c0_i32 = arith.constant 0 : i32
    %c0_i32_0 = arith.constant 0 : i32
    %c0_i32_1 = arith.constant 0 : i32
    return %c0_i32, %c0_i32_0 : i32, i32
  }
  func.func @transform_13(%arg0: i32) -> (i32, i32) {
    %c0_i32 = arith.constant 0 : i32
    %c0_i32_0 = arith.constant 0 : i32
    return %arg0, %c0_i32 : i32, i32
  }
}

</mosaic_0001>

<bundles_post_ra>
// kernel: text_detection_forward.5
= control target key start
LH: loop header
LB: loop body
LE: loop exit
PB: predicated region body
PF: predicated region fallthrough
CT: control target
= control target key end

     0   :  { %s712_s21 = smov 0   ;;  %s714_s22 = smov 0   ;;  %s779_s0 = inlined_call_operand.vmem [shape: bf16[4,128,9], index: 0, kind: input, shape index: {}]   ;;  %s780_s1 = inlined_call_operand.vmem [shape: bf16[9,64], index: 1, kind: input, shape index: {}]   ;;  %s781_s2 = inlined_call_operand.vmem [shape: f32[1,64], index: 2, kind: input, shape index: {}]   ;;  %s782_s3 = inlined_call_operand.vmem [shape: f32[1,64], index: 3, kind: input, shape index: {}]   ;;  %s783_s4 = inlined_call_operand.vmem [shape: f32[1,64], index: 4, kind: input, shape index: {}]   ;;  %s784_s5 = inlined_call_operand.vmem [shape: f32[1,64], index: 5, kind: input, shape index: {}]   ;;  %s785_s6 = inlined_call_operand.vmem [shape: bf16[128,64], index: 6, kind: output, shape index: {}]  }
   0x1   :  { %s716_s23 = smov 0  }
   0x2 LB: > { %s576_s24 = sadd.s32 4294967295, %s674_s23   ;;  %s729_s25 = sadd.s32 1, %s674_s23   ;;  %s674_s23 = sphi %s716_s23, %s788_s23   ;;  %s670_s22 = sphi %s714_s22, %s787_s22   ;;  %s666_s21 = sphi %s712_s21, %s786_s21  }
   0x3   : > { %s20_s26 = ssub.s32 %s674_s23, %s729_s25  ;;  %s23_s27 = sadd.s32 1, %s670_s22 }
   0x4   : > { %p21_p0 = scmp.eq.s32.totalorder %s20_s26, 0  ;;  %p30_p1 = scmp.ne.s32.totalorder %s670_s22, %s666_s21 }
   0x5   : > { %p31_p2 = scmp.eq.s32.totalorder %s674_s23, 0  ;;  %p579_p4 = scmp.ge.s32.totalorder %s674_s23, 8 }
   0x6   : > { %s738_s28 = scalar_select %p21_p0, %s670_s22, %s23_s27  }
   0x7   : > { %p32_p3 = por %p31_p2, %p30_p1  ;;  %202 = sbr.rel (%p579_p4) target bundleno = 20 (0x14), region = 36 }
   0xc   : > { %205 = sbr.rel (!%p32_p3) target bundleno = 20 (0x14), region = 40  ;;  %s207_s29 = sand.u32 (%p32_p3), 1, %s670_s22  }
   0xd   : > { %s600_s30 = sshll.u32 (%p32_p3), %s674_s23, 3  ;;  %s580_s7 = sshll.u32 (%p32_p3), %s207_s29, 5 }
   0xe   : > { %s212_s10 = scalar_lea.vmem (%p32_p3), %s779_s0, %s600_s30  ;;  %s209_s11 = scalar_lea.vmem (%p32_p3), [#allocation2], %s580_s7 }
   0xf   : > { %v229_v0 = vld [vmem:[%s212_s10] sm:$0xff] (%p32_p3)  }
  0x10   : > { %v233_v1 = vld [vmem:[%s212_s10 + $0x40] sm:$0xff] (%p32_p3)   ;;  %230 = vst [vmem:[%s209_s11] sm:$0xff] (%p32_p3), %v229_v0  }
  0x11   : > { %v237_v2 = vld [vmem:[%s212_s10 + $0x80] sm:$0xff]   ;;  %234 = vst [vmem:[%s209_s11 + $0x8] sm:$0xff] %v233_v1  }
  0x12   : > { %238 = vst [vmem:[%s209_s11 + $0x10] sm:$0xff] %v237_v2   ;;  %v241_v3 = vld [vmem:[%s212_s10 + $0xc0] sm:$0xff]  }
  0x13   : > { %242 = vst [vmem:[%s209_s11 + $0x18] sm:$0xff] %v241_v3  }
  0x14 PF: > { %p583_p5 = scmp.ge.s32.totalorder %s674_s23, 1  ;;  %p283_p6 = scmp.lt.s32.totalorder %s674_s23, 9 }
  0x16   : > { %p284_p7 = pnand %p583_p5, %p283_p6 }
  0x17   : > { %s290_s14 = sand.u32 (!%p284_p7), 1, %s666_s21   ;;  %s585_s30 = sshll.u32 (!%p284_p7), %s576_s24, 1 }
  0x18   : > { %287 = sbr.rel (%p284_p7) target bundleno = 250 (0xfa), region = 81  ;;  %s584_s15 = sshll.u32 (!%p284_p7), %s290_s14, 5 }
  0x19   : > { %s292_s16 = scalar_lea.vmem (!%p284_p7), [#allocation2], %s584_s15  ;;  %p321_p8 = scmp.lt.s32.totalorder (!%p284_p7), %s585_s30, 15 }
  0x1d   : > { %v645_v4 = vld [vmem:[%s780_s1] sm:$0x1f]   ;;  %vm375_vm0 = vcmask 1043456   ;;  %vm376_vm1 = vcmask 1044480   ;;  %v676_v5 = vmov 65535   ;;  %vm362_vm2 = vcmask 72704  }
  0x1e   : > { %v377_v6 = vsel %vm375_vm0, 4294967295, %v676_v5  ;;  %v646_v9 = vld [vmem:[%s292_s16] sm:$0xff]   ;;  %v647_v10 = vld [vmem:[%s292_s16 + $0x10] sm:$0xff]   ;;  %v648_v11 = vld [vmem:[%s292_s16 + $0x8] sm:$0xff]   ;;  %v462_v23 = vlaneseq  ;;  %s790_s30 = smov (!%p321_p8, %s585_s30), 15  ;;  %vm511_vm3 = vcmask 519168  }
  0x1f   : > { %v378_v7 = vsel %vm376_vm1, %v377_v6, 0  ;;  %v649_v12 = vld [vmem:[%s292_s16 + $0x18] sm:$0xff]   ;;  %610 = vmatprep.mubr.msk.bf16.mxu0 %vm362_vm2, %v646_v9  ;;  %614 = vmatprep.mubr.msk.bf16.mxu1 %vm362_vm2, %v647_v10  ;;  %v447_v13 = vld [vmem:[%s781_s2] sm:$0x1]  ;;  %s586_s23 = sshll.u32 %s790_s30, 2 }
  0x20   : > { %v380_v8 = vand.u32 %v645_v4, %v378_v7  ;;  %v448_v14 = vmul.f32 0.001953125, %v447_v13  ;;  %v449_v15 = vld [vmem:[%s782_s3] sm:$0x1]  ;;  %v463_v25 = vshrl.u32 %v462_v23, 7  ;;  %s324_s8 = scalar_lea.vmem %s785_s6, %s586_s23 }
  0x21   : > { %v450_v16 = vmul.f32 0.001953125, %v449_v15  ;;  %v454_v22 = vld [vmem:[%s783_s4] sm:$0x1] }
  0x22   : > { %608 = vmatprep.subr.bf16.mxu0 %v380_v8  ;;  %618 = vmatprep.subr.bf16.mxu1 %v380_v8  ;;  %v451_v17 = vmul.f32 %v448_v14, %v448_v14  ;;  %v458_v27 = vld [vmem:[%s784_s5] sm:$0x1]  ;;  %v464_v28 = vsub.s32 0, %v463_v25 }
  0x23   : > { %609 = vmatpush3.bf16.msra.mxu0 %v380_v8  ;;  %619 = vmatpush3.bf16.msra.mxu1 %v380_v8 }
  0x24   : > { %v452_v18 = vsub.f32 %v450_v16, %v451_v17 }
  0x26   : > { %611 = vmatmul.mubr.msk.bf16.vlgmr.msra.gmra.mxu0 %vm362_vm2, %v648_v11  ;;  %615 = vmatmul.mubr.msk.bf16.vlgmr.msra.gmra.mxu1 %vm362_vm2, %v649_v12  ;;  %v453_v19 = vmax.f32 %v452_v18, 0.0 }
  0x28   : > { %v455_v20 = vadd.f32 1e-05, %v453_v19 }
  0x2a   : > { %650 = vrsqrt.f32 %v455_v20 }
  0x37   : > { %v651_v21 = vpop.eup %650 }
  0x38   : > { %v457_v24 = vmul.f32 %v651_v21, %v454_v22 }
  0x3a   : > { %v459_v26 = vmul.f32 %v457_v24, %v448_v14  ;;  %v465_v30 = vrot.slane %v457_v24, %v464_v28 }
  0x3c   : > { %v460_v29 = vsub.f32 %v458_v27, %v459_v26 }
  0x3e   : > { %v479_v31 = vrot.slane %v460_v29, %v464_v28 }
  0xe6   : > { %v612_v32 = vpop.f32.mrf.mxu0  ;;  %v616_v33 = vpop.f32.mrf.mxu1 }
  0xe7   : > { %v469_v34 = vmul.f32 %v612_v32, %v465_v30  ;;  %v473_v35 = vmul.f32 %v616_v33, %v465_v30 }
  0xe8   : > { %v416_v36 = vpop.f32.mrf.mxu0  ;;  %v432_v37 = vpop.f32.mrf.mxu1 }
  0xe9   : > { %v483_v38 = vadd.f32 %v479_v31, %v469_v34  ;;  %v487_v39 = vadd.f32 %v479_v31, %v473_v35  ;;  %v467_v40 = vmul.f32 %v465_v30, %v416_v36  ;;  %v471_v41 = vmul.f32 %v465_v30, %v432_v37 }
  0xea   : > { %v613_v42 = vpop.f32.mrf.mxu0  ;;  %v617_v43 = vpop.f32.mrf.mxu1 }
  0xeb   : > { %v481_v44 = vadd.f32 %v479_v31, %v467_v40  ;;  %v485_v45 = vadd.f32 %v479_v31, %v471_v41  ;;  %v491_v46 = vmax.f32 %v483_v38, 0.0  ;;  %v495_v47 = vmax.f32 %v487_v39, 0.0 }
  0xec   : > { %v470_v48 = vmul.f32 %v613_v42, %v465_v30  ;;  %v474_v49 = vmul.f32 %v617_v43, %v465_v30  ;;  %v419_v50 = vpop.f32.mrf.mxu0  ;;  %v435_v51 = vpop.f32.mrf.mxu1 }
  0xed   : > { %v489_v52 = vmax.f32 %v481_v44, 0.0  ;;  %v493_v53 = vmax.f32 %v485_v45, 0.0  ;;  %v468_v54 = vmul.f32 %v465_v30, %v419_v50  ;;  %v472_v55 = vmul.f32 %v465_v30, %v435_v51 }
  0xee   : > { %v484_v56 = vadd.f32 %v479_v31, %v470_v48  ;;  %v488_v57 = vadd.f32 %v479_v31, %v474_v49 }
  0xef   : > { %v497_v58 = vmax.f32 %v489_v52, %v491_v46  ;;  %v499_v59 = vmax.f32 %v493_v53, %v495_v47  ;;  %v482_v60 = vadd.f32 %v479_v31, %v468_v54  ;;  %v486_v61 = vadd.f32 %v479_v31, %v472_v55 }
  0xf0   : > { %v492_v62 = vmax.f32 %v484_v56, 0.0  ;;  %v496_v0 = vmax.f32 %v488_v57, 0.0 }
  0xf1   : > { %v501_v63 = vmax.f32 %v497_v58, %v499_v59  ;;  %v490_v1 = vmax.f32 %v482_v60, 0.0  ;;  %v494_v2 = vmax.f32 %v486_v61, 0.0 }
  0xf3   : > { %v601_v3 = vpack.c.bf16 %v501_v63, %v501_v63  ;;  %v498_v4 = vmax.f32 %v490_v1, %v492_v62  ;;  %v500_v5 = vmax.f32 %v494_v2, %v496_v0 }
  0xf5   : > { %512 = vst.msk [vmem:[%s324_s8] sm:$0xf] %vm511_vm3, %v601_v3  ;;  %v502_v6 = vmax.f32 %v498_v4, %v500_v5 }
  0xf7   : > { %v602_v7 = vpack.c.bf16 %v502_v6, %v502_v6 }
  0xf9   : > { %513 = vst.msk [vmem:[%s324_s8 + $0x4] sm:$0xf] %vm511_vm3, %v602_v7 }
  0xfa PF: > { %p13_p9 = scmp.ge.s32.totalorder %s729_s25, 10   ;;  %s786_s21 = smov %s670_s22 }
  0xfb   : > { %s787_s22 = smov %s738_s28  ;;  %s788_s23 = smov %s729_s25 }
  0xfc   :  { %15 = sbr.rel (!%p13_p9) target bundleno = 2 (0x2), region = 120 }

// kernel: text_detection_forward.4
= control target key start
LH: loop header
LB: loop body
LE: loop exit
PB: predicated region body
PF: predicated region fallthrough
CT: control target
= control target key end

     0   :  { %s568_s12 = smov 0   ;;  %s570_s13 = smov 0   ;;  %s654_s0 = inlined_call_operand.vmem [shape: bf16[4,128,9], index: 0, kind: input, shape index: {}]   ;;  %s655_s1 = inlined_call_operand.vmem [shape: bf16[9,64], index: 1, kind: input, shape index: {}]   ;;  %s656_s2 = inlined_call_operand.vmem [shape: f32[1,64], index: 2, kind: output, shape index: {0}]   ;;  %s657_s3 = inlined_call_operand.vmem [shape: f32[1,64], index: 3, kind: output, shape index: {1}]  }
   0x1   :  { %s572_s14 = smov 0  }
   0x2 LB: > { %s453_s15 = sadd.s32 4294967295, %s544_s14   ;;  %s585_s16 = sadd.s32 1, %s544_s14   ;;  %s544_s14 = sphi %s572_s14, %s660_s14   ;;  %s540_s13 = sphi %s570_s13, %s659_s13   ;;  %s536_s12 = sphi %s568_s12, %s658_s12  }
   0x3   : > { %s18_s17 = ssub.s32 %s544_s14, %s585_s16  ;;  %s21_s18 = sadd.s32 1, %s540_s13 }
   0x4   : > { %p19_p0 = scmp.eq.s32.totalorder %s18_s17, 0  ;;  %p28_p1 = scmp.ne.s32.totalorder %s540_s13, %s536_s12 }
   0x5   : > { %p29_p2 = scmp.eq.s32.totalorder %s544_s14, 0  ;;  %p455_p4 = scmp.ge.s32.totalorder %s544_s14, 8 }
   0x6   : > { %s594_s19 = scalar_select %p19_p0, %s540_s13, %s21_s18  }
   0x7   : > { %p30_p3 = por %p29_p2, %p28_p1  ;;  %120 = sbr.rel (%p455_p4) target bundleno = 20 (0x14), region = 20 }
   0xc   : > { %123 = sbr.rel (!%p30_p3) target bundleno = 20 (0x14), region = 24  ;;  %s125_s20 = sand.u32 (%p30_p3), 1, %s540_s13  }
   0xd   : > { %s473_s21 = sshll.u32 (%p30_p3), %s544_s14, 3  ;;  %s456_s22 = sshll.u32 (%p30_p3), %s125_s20, 5 }
   0xe   : > { %s130_s25 = scalar_lea.vmem (%p30_p3), %s654_s0, %s473_s21  ;;  %s127_s26 = scalar_lea.vmem (%p30_p3), [#allocation2], %s456_s22 }
   0xf   : > { %v147_v0 = vld [vmem:[%s130_s25] sm:$0xff] (%p30_p3)  }
  0x10   : > { %v151_v1 = vld [vmem:[%s130_s25 + $0x40] sm:$0xff] (%p30_p3)   ;;  %148 = vst [vmem:[%s127_s26] sm:$0xff] (%p30_p3), %v147_v0  }
  0x11   : > { %v155_v2 = vld [vmem:[%s130_s25 + $0x80] sm:$0xff]   ;;  %152 = vst [vmem:[%s127_s26 + $0x8] sm:$0xff] %v151_v1  }
  0x12   : > { %156 = vst [vmem:[%s127_s26 + $0x10] sm:$0xff] %v155_v2   ;;  %v159_v3 = vld [vmem:[%s130_s25 + $0xc0] sm:$0xff]  }
  0x13   : > { %160 = vst [vmem:[%s127_s26 + $0x18] sm:$0xff] %v159_v3  }
  0x14 PF: > { %p459_p5 = scmp.ge.s32.totalorder %s544_s14, 1  ;;  %p201_p6 = scmp.lt.s32.totalorder %s544_s14, 9 }
  0x16   : > { %p202_p7 = pnand %p459_p5, %p201_p6 }
  0x17   : > { %s208_s27 = sand.u32 (!%p202_p7), 1, %s536_s12   ;;  %p461_p8 = scmp.ne.s32.totalorder (!%p202_p7), %s453_s15, 0 }
  0x18   : > { %205 = sbr.rel (%p202_p7) target bundleno = 276 (0x114), region = 65  ;;  %s460_s28 = sshll.u32 (!%p202_p7), %s208_s27, 5 }
  0x19   : > { %s210_s29 = scalar_lea.vmem (!%p202_p7), [#allocation2], %s460_s28 }
  0x1d   : > { %231 = sbr.rel (%p461_p8) target bundleno = 36 (0x24), region = 73 }
  0x22   : > { %vm232_vm0 = vcmask 516096   ;;  %v546_v4 = vmov 0.0  }
  0x23   : > { %233 = vst.msk [vmem:[%s656_s2] sm:$0x1] %vm232_vm0, %v546_v4  ;;  %234 = vst.msk [vmem:[%s657_s3] sm:$0x1] %vm232_vm0, %v546_v4 }
  0x24 PF: > { %v517_v5 = vld [vmem:[%s655_s1] sm:$0x1f]   ;;  %vm283_vm1 = vcmask 1043456   ;;  %vm284_vm2 = vcmask 1044480   ;;  %v547_v7 = vmov 65535   ;;  %vm270_vm3 = vcmask 72704  }
  0x25   : > { %v518_v6 = vld [vmem:[%s210_s29] sm:$0xff]   ;;  %v285_v8 = vsel %vm283_vm1, 4294967295, %v547_v7  ;;  %v520_v11 = vld [vmem:[%s210_s29 + $0x10] sm:$0xff]   ;;  %v519_v12 = vld [vmem:[%s210_s29 + $0x8] sm:$0xff]   ;;  %vm356_vm4 = vcmask 523264   ;;  %vm379_vm5 = vcmask 516096  }
  0x26   : > { %v286_v9 = vsel %vm284_vm2, %v285_v8, 0  ;;  %481 = vmatprep.mubr.msk.bf16.mxu0 %vm270_vm3, %v518_v6  ;;  %v521_v13 = vld [vmem:[%s210_s29 + $0x18] sm:$0xff]   ;;  %485 = vmatprep.mubr.msk.bf16.mxu1 %vm270_vm3, %v520_v11 }
  0x27   : > { %v288_v10 = vand.u32 %v517_v5, %v286_v9 }
  0x29   : > { %479 = vmatprep.subr.bf16.mxu0 %v288_v10  ;;  %489 = vmatprep.subr.bf16.mxu1 %v288_v10 }
  0x2a   : > { %480 = vmatpush3.bf16.msra.mxu0 %v288_v10  ;;  %490 = vmatpush3.bf16.msra.mxu1 %v288_v10  ;;  %v355_v5 = vld [vmem:[%s656_s2] sm:$0x1] }
  0x2b   : > { %v381_v8 = vld [vmem:[%s657_s3] sm:$0x1] }
  0x2d   : > { %482 = vmatmul.mubr.msk.bf16.vlgmr.msra.gmra.mxu0 %vm270_vm3, %v519_v12  ;;  %486 = vmatmul.mubr.msk.bf16.vlgmr.msra.gmra.mxu1 %vm270_vm3, %v521_v13 }
  0xed   : > { %v483_v14 = vpop.f32.mrf.mxu0  ;;  %v487_v15 = vpop.f32.mrf.mxu1 }
  0xee   : > { %v384_v22 = vmul.f32 %v483_v14, %v483_v14  ;;  %v360_v27 = vsel %vm356_vm4, %v483_v14, 0.0  ;;  %v388_v44 = vmul.f32 %v487_v15, %v487_v15  ;;  %v368_v49 = vsel %vm356_vm4, %v487_v15, 0.0 }
  0xef   : > { %v324_v16 = vpop.f32.mrf.mxu0  ;;  %v340_v17 = vpop.f32.mrf.mxu1 }
  0xf0   : > { %v382_v19 = vmul.f32 %v324_v16, %v324_v16  ;;  %v357_v23 = vsel %vm356_vm4, %v324_v16, 0.0  ;;  %v393_v34 = vsel %vm356_vm4, %v384_v22, 0.0  ;;  %v386_v36 = vmul.f32 %v340_v17, %v340_v17 }
  0xf1   : > { %v484_v18 = vpop.f32.mrf.mxu0  ;;  %v488_v21 = vpop.f32.mrf.mxu1  ;;  %v364_v40 = vsel %vm356_vm4, %v340_v17, 0.0  ;;  %v401_v54 = vsel %vm356_vm4, %v388_v44, 0.0 }
  0xf2   : > { %v390_v28 = vsel %vm356_vm4, %v382_v19, 0.0  ;;  %v385_v29 = vmul.f32 %v484_v18, %v484_v18  ;;  %v362_v35 = vsel %vm356_vm4, %v484_v18, 0.0  ;;  %v397_v45 = vsel %vm356_vm4, %v386_v36, 0.0 }
  0xf3   : > { %v327_v20 = vpop.f32.mrf.mxu0  ;;  %v343_v33 = vpop.f32.mrf.mxu1  ;;  %v389_v50 = vmul.f32 %v488_v21, %v488_v21  ;;  %v370_v55 = vsel %vm356_vm4, %v488_v21, 0.0 }
  0xf4   : > { %v358_v24 = vsel %vm356_vm4, %v327_v20, 0.0  ;;  %v383_v25 = vmul.f32 %v327_v20, %v327_v20  ;;  %v395_v39 = vsel %vm356_vm4, %v385_v29, 0.0  ;;  %v387_v41 = vmul.f32 %v343_v33, %v343_v33 }
  0xf5   : > { %v359_v26 = vadd.f32 %v358_v24, %v357_v23  ;;  %v366_v46 = vsel %vm356_vm4, %v343_v33, 0.0  ;;  %v403_v58 = vsel %vm356_vm4, %v389_v50, 0.0 }
  0xf6   : > { %v391_v30 = vsel %vm356_vm4, %v383_v25, 0.0  ;;  %v399_v51 = vsel %vm356_vm4, %v387_v41, 0.0 }
  0xf7   : > { %v361_v31 = vadd.f32 %v360_v27, %v359_v26  ;;  %v392_v32 = vadd.f32 %v391_v30, %v390_v28 }
  0xf9   : > { %v394_v37 = vadd.f32 %v393_v34, %v392_v32  ;;  %v363_v38 = vadd.f32 %v362_v35, %v361_v31 }
  0xfb   : > { %v365_v42 = vadd.f32 %v364_v40, %v363_v38  ;;  %v396_v43 = vadd.f32 %v395_v39, %v394_v37 }
  0xfd   : > { %v367_v47 = vadd.f32 %v366_v46, %v365_v42  ;;  %v398_v48 = vadd.f32 %v397_v45, %v396_v43 }
  0xff   : > { %v369_v52 = vadd.f32 %v368_v49, %v367_v47  ;;  %v400_v53 = vadd.f32 %v399_v51, %v398_v48 }
 0x101   : > { %v371_v56 = vadd.f32 %v370_v55, %v369_v52  ;;  %v402_v57 = vadd.f32 %v401_v54, %v400_v53 }
 0x103   : > { %v372_v59 = vrot.slane %v371_v56, 4  ;;  %v404_v60 = vadd.f32 %v403_v58, %v402_v57 }
 0x105   : > { %v373_v61 = vadd.f32 %v372_v59, %v371_v56  ;;  %v405_v62 = vrot.slane %v404_v60, 4 }
 0x107   : > { %v374_v63 = vrot.slane %v373_v61, 2  ;;  %v406_v0 = vadd.f32 %v405_v62, %v404_v60 }
 0x109   : > { %v375_v1 = vadd.f32 %v374_v63, %v373_v61  ;;  %v407_v2 = vrot.slane %v406_v0, 2 }
 0x10b   : > { %v376_v3 = vrot.slane %v375_v1, 1  ;;  %v408_v4 = vadd.f32 %v407_v2, %v406_v0 }
 0x10d   : > { %v377_v6 = vadd.f32 %v376_v3, %v375_v1  ;;  %v409_v7 = vrot.slane %v408_v4, 1 }
 0x10f   : > { %v378_v9 = vadd.f32 %v377_v6, %v355_v5  ;;  %v410_v10 = vadd.f32 %v409_v7, %v408_v4 }
 0x111   : > { %380 = vst.msk [vmem:[%s656_s2] sm:$0x1] %vm379_vm5, %v378_v9  ;;  %v411_v11 = vadd.f32 %v410_v10, %v381_v8 }
 0x113   : > { %412 = vst.msk [vmem:[%s657_s3] sm:$0x1] %vm379_vm5, %v411_v11 }
 0x114 PF: > { %p11_p9 = scmp.ge.s32.totalorder %s585_s16, 10   ;;  %s658_s12 = smov %s540_s13 }
 0x115   : > { %s659_s13 = smov %s594_s19  ;;  %s660_s14 = smov %s585_s16 }
 0x116   :  { %13 = sbr.rel (!%p11_p9) target bundleno = 2 (0x2), region = 112 }

// kernel: text_detection_forward.6
= control target key start
LH: loop header
LB: loop body
LE: loop exit
PB: predicated region body
PF: predicated region fallthrough
CT: control target
= control target key end

     0   :  { %s1278_s12 = smov 0   ;;  %s1280_s13 = smov 0   ;;  %s1527_s0 = inlined_call_operand.vmem [shape: bf16[4,32,576], index: 0, kind: input, shape index: {}]   ;;  %s1528_s1 = inlined_call_operand.vmem [shape: bf16[576,128], index: 1, kind: input, shape index: {}]   ;;  %s1529_s2 = inlined_call_operand.vmem [shape: f32[1,128], index: 2, kind: output, shape index: {0}]   ;;  %s1530_s3 = inlined_call_operand.vmem [shape: f32[1,128], index: 3, kind: output, shape index: {1}]  }
   0x1   :  { %s1282_s14 = smov 0  }
   0x2 LB: > { %s943_s15 = sadd.s32 4294967295, %s1255_s14   ;;  %s1295_s16 = sadd.s32 1, %s1255_s14   ;;  %s1255_s14 = sphi %s1282_s14, %s1533_s14   ;;  %s1251_s13 = sphi %s1280_s13, %s1532_s13   ;;  %s1247_s12 = sphi %s1278_s12, %s1531_s12  }
   0x3   : > { %s18_s17 = ssub.s32 %s1255_s14, %s1295_s16  ;;  %s21_s18 = sadd.s32 1, %s1251_s13 }
   0x4   : > { %p19_p0 = scmp.eq.s32.totalorder %s18_s17, 0  ;;  %p28_p1 = scmp.ne.s32.totalorder %s1251_s13, %s1247_s12 }
   0x5   : > { %p29_p2 = scmp.eq.s32.totalorder %s1255_s14, 0  ;;  %p945_p4 = scmp.ge.s32.totalorder %s1255_s14, 2 }
   0x6   : > { %s1304_s19 = scalar_select %p19_p0, %s1251_s13, %s21_s18  }
   0x7   : > { %p30_p3 = por %p29_p2, %p28_p1  ;;  %120 = sbr.rel (%p945_p4) target bundleno = 30 (0x1e), region = 20 }
   0xc   : > { %123 = sbr.rel (!%p30_p3) target bundleno = 30 (0x1e), region = 24  ;;  %s125_s20 = sand.u32 (%p30_p3), 1, %s1251_s13  }
   0xd   : > { %s1142_s21 = smul.u32 (%p30_p3), 40, %s1255_s14 }
   0xe   : > { %s1141_s22 = smul.u32 (%p30_p3), 160, %s125_s20 }
   0xf   : > { %s1312_s25 = scalar_lea.vmem (%p30_p3), %s1527_s0, %s1142_s21 }
  0x10   : > { %v146_v0 = vld [vmem:[%s1312_s25] sm:$0xff] (%p30_p3)  ;;  %v148_v1 = vld [vmem:[%s1312_s25 + $0x8] sm:$0xff] (%p30_p3)  ;;  %v150_v2 = vld [vmem:[%s1312_s25 + $0x14] sm:$0xff] (%p30_p3)  ;;  %s1317_s26 = scalar_lea.vmem (%p30_p3), [#allocation2], %s1141_s22 }
  0x11   : > { %147 = vst [vmem:[%s1317_s26] sm:$0xff] %v146_v0  ;;  %149 = vst [vmem:[%s1317_s26 + $0x8] sm:$0xff] %v148_v1  ;;  %v152_v3 = vld [vmem:[%s1312_s25 + $0x1c] sm:$0xff]  ;;  %v154_v4 = vld [vmem:[%s1312_s25 + $0x50] sm:$0xff] }
  0x12   : > { %151 = vst [vmem:[%s1317_s26 + $0x14] sm:$0xff] %v150_v2  ;;  %v156_v5 = vld [vmem:[%s1312_s25 + $0x58] sm:$0xff]  ;;  %153 = vst [vmem:[%s1317_s26 + $0x1c] sm:$0xff] %v152_v3  ;;  %v158_v6 = vld [vmem:[%s1312_s25 + $0x64] sm:$0xff] }
  0x13   : > { %155 = vst [vmem:[%s1317_s26 + $0x28] sm:$0xff] %v154_v4  ;;  %157 = vst [vmem:[%s1317_s26 + $0x30] sm:$0xff] %v156_v5  ;;  %v160_v7 = vld [vmem:[%s1312_s25 + $0x6c] sm:$0xff]  ;;  %v162_v8 = vld [vmem:[%s1312_s25 + $0xa0] sm:$0xff] }
  0x14   : > { %159 = vst [vmem:[%s1317_s26 + $0x3c] sm:$0xff] %v158_v6  ;;  %161 = vst [vmem:[%s1317_s26 + $0x44] sm:$0xff] %v160_v7  ;;  %v164_v9 = vld [vmem:[%s1312_s25 + $0xa8] sm:$0xff]  ;;  %v166_v10 = vld [vmem:[%s1312_s25 + $0xb4] sm:$0xff] }
  0x15   : > { %163 = vst [vmem:[%s1317_s26 + $0x50] sm:$0xff] %v162_v8  ;;  %v168_v11 = vld [vmem:[%s1312_s25 + $0xbc] sm:$0xff]  ;;  %165 = vst [vmem:[%s1317_s26 + $0x58] sm:$0xff] %v164_v9  ;;  %v170_v12 = vld [vmem:[%s1312_s25 + $0xf0] sm:$0xff] }
  0x16   : > { %167 = vst [vmem:[%s1317_s26 + $0x64] sm:$0xff] %v166_v10  ;;  %169 = vst [vmem:[%s1317_s26 + $0x6c] sm:$0xff] %v168_v11  ;;  %v172_v13 = vld [vmem:[%s1312_s25 + $0xf8] sm:$0xff]  ;;  %v174_v14 = vld [vmem:[%s1312_s25 + $0x104] sm:$0xff] }
  0x17   : > { %171 = vst [vmem:[%s1317_s26 + $0x78] sm:$0xff] %v170_v12  ;;  %173 = vst [vmem:[%s1317_s26 + $0x80] sm:$0xff] %v172_v13  ;;  %v176_v15 = vld [vmem:[%s1312_s25 + $0x10c] sm:$0xff]  ;;  %v951_v17 = vld [vmem:[%s1312_s25 + $0x24] sm:$0xf] }
  0x18   : > { %175 = vst [vmem:[%s1317_s26 + $0x8c] sm:$0xff] %v174_v14  ;;  %v949_v16 = vld [vmem:[%s1312_s25 + $0x10] sm:$0xf]  ;;  %177 = vst [vmem:[%s1317_s26 + $0x94] sm:$0xff] %v176_v15  ;;  %v953_v18 = vld [vmem:[%s1312_s25 + $0x60] sm:$0xf] }
  0x19   : > { %950 = vst [vmem:[%s1317_s26 + $0x10] sm:$0xf] %v949_v16  ;;  %952 = vst [vmem:[%s1317_s26 + $0x24] sm:$0xf] %v951_v17  ;;  %v955_v19 = vld [vmem:[%s1312_s25 + $0x74] sm:$0xf] }
  0x1a   : > { %v957_v20 = vld [vmem:[%s1312_s25 + $0xb0] sm:$0xf]  ;;  %954 = vst [vmem:[%s1317_s26 + $0x38] sm:$0xf] %v953_v18  ;;  %956 = vst [vmem:[%s1317_s26 + $0x4c] sm:$0xf] %v955_v19 }
  0x1b   : > { %958 = vst [vmem:[%s1317_s26 + $0x60] sm:$0xf] %v957_v20  ;;  %v959_v21 = vld [vmem:[%s1312_s25 + $0xc4] sm:$0xf]  ;;  %v961_v22 = vld [vmem:[%s1312_s25 + $0x100] sm:$0xf] }
  0x1c   : > { %v963_v23 = vld [vmem:[%s1312_s25 + $0x114] sm:$0xf]  ;;  %960 = vst [vmem:[%s1317_s26 + $0x74] sm:$0xf] %v959_v21  ;;  %962 = vst [vmem:[%s1317_s26 + $0x88] sm:$0xf] %v961_v22 }
  0x1d   : > { %964 = vst [vmem:[%s1317_s26 + $0x9c] sm:$0xf] %v963_v23 }
  0x1e PF: > { %p965_p5 = scmp.ge.s32.totalorder %s1255_s14, 1  ;;  %p206_p6 = scmp.lt.s32.totalorder %s1255_s14, 3 }
  0x20   : > { %p207_p7 = pnand %p965_p5, %p206_p6 }
  0x21   : > { %s213_s27 = sand.u32 (!%p207_p7), 1, %s1247_s12   ;;  %p966_p8 = scmp.ne.s32.totalorder (!%p207_p7), %s943_s15, 0 }
  0x22   : > { %210 = sbr.rel (%p207_p7) target bundleno = 344 (0x158), region = 50 }
  0x23   : > { %s1143_s28 = smul.u32 (!%p207_p7), 160, %s213_s27 }
  0x25   : > { %s1367_s29 = scalar_lea.vmem (!%p207_p7), [#allocation2], %s1143_s28 }
  0x27   : > { %236 = sbr.rel (%p966_p8) target bundleno = 46 (0x2e), region = 58 }
  0x2c   : > { %v1257_v24 = vmov 0.0  }
  0x2d   : > { %237 = vst [vmem:[%s1529_s2] sm:$0x1] %v1257_v24  ;;  %238 = vst [vmem:[%s1530_s3] sm:$0x1] %v1257_v24 }
  0x2e PF: > { %v1169_v25 = vld [vmem:[%s1528_s1 + $0x78] sm:$0xff]   ;;  %v1173_v29 = vld [vmem:[%s1528_s1 + $0x70] sm:$0xff]   ;;  %v1177_v33 = vld [vmem:[%s1528_s1 + $0x68] sm:$0xff]   ;;  %vm651_vm0 = vcmask 523264  }
  0x2f   : > { %v1170_v26 = vld [vmem:[%s1528_s1 + $0xf8] sm:$0xff]   ;;  %1029 = vmatprep.subr.bf16.mxu0 %v1169_v25  ;;  %v1174_v30 = vld [vmem:[%s1528_s1 + $0xf0] sm:$0xff]   ;;  %v1178_v34 = vld [vmem:[%s1528_s1 + $0xe8] sm:$0xff]  }
  0x30   : > { %v1171_v27 = vld [vmem:[%s1528_s1 + $0x38] sm:$0xff]   ;;  %1069 = vmatprep.subr.bf16.mxu1 %v1170_v26  ;;  %v1175_v31 = vld [vmem:[%s1528_s1 + $0x30] sm:$0xff]   ;;  %v1179_v35 = vld [vmem:[%s1528_s1 + $0x28] sm:$0xff]  }
  0x31   : > { %v1172_v28 = vld [vmem:[%s1528_s1 + $0xb8] sm:$0xff]   ;;  %1030 = vmatpush3.bf16.msra.mxu0 %v1171_v27  ;;  %v1176_v32 = vld [vmem:[%s1528_s1 + $0xb0] sm:$0xff]   ;;  %v1180_v36 = vld [vmem:[%s1528_s1 + $0xa8] sm:$0xff]  }
  0x32   : > { %1070 = vmatpush3.bf16.msra.mxu1 %v1172_v28  ;;  %1031 = vmatprep.subr.bf16.mxu0 %v1173_v29  ;;  %v1181_v37 = vld [vmem:[%s1528_s1 + $0x60] sm:$0xff]   ;;  %v1185_v41 = vld [vmem:[%s1528_s1 + $0x58] sm:$0xff]   ;;  %v1189_v45 = vld [vmem:[%s1528_s1 + $0x50] sm:$0xff]  }
  0x33   : > { %1071 = vmatprep.subr.bf16.mxu1 %v1174_v30  ;;  %v1182_v38 = vld [vmem:[%s1528_s1 + $0xe0] sm:$0xff]   ;;  %v1186_v42 = vld [vmem:[%s1528_s1 + $0xd8] sm:$0xff]   ;;  %v1190_v46 = vld [vmem:[%s1528_s1 + $0xd0] sm:$0xff]  }
  0x34   : > { %v1183_v39 = vld [vmem:[%s1528_s1 + $0x20] sm:$0xff]   ;;  %v1187_v43 = vld [vmem:[%s1528_s1 + $0x18] sm:$0xff]   ;;  %v1191_v47 = vld [vmem:[%s1528_s1 + $0x10] sm:$0xff]  }
  0x35   : > { %1032 = vmatpush3.bf16.msra.mxu0 %v1175_v31  ;;  %v1184_v40 = vld [vmem:[%s1528_s1 + $0xa0] sm:$0xff]   ;;  %v1188_v44 = vld [vmem:[%s1528_s1 + $0x98] sm:$0xff]   ;;  %v1192_v48 = vld [vmem:[%s1528_s1 + $0x90] sm:$0xff]  }
  0x36   : > { %1072 = vmatpush3.bf16.msra.mxu1 %v1176_v32  ;;  %1033 = vmatprep.subr.bf16.mxu0 %v1177_v33  ;;  %v1193_v49 = vld [vmem:[%s1528_s1 + $0x48] sm:$0xff]   ;;  %v1197_v53 = vld [vmem:[%s1528_s1 + $0x40] sm:$0xff]   ;;  %v1207_v61 = vld [vmem:[%s1528_s1 + $0x118] sm:$0xff]  }
  0x37   : > { %1073 = vmatprep.subr.bf16.mxu1 %v1178_v34  ;;  %v1194_v50 = vld [vmem:[%s1528_s1 + $0xc8] sm:$0xff]   ;;  %v1198_v54 = vld [vmem:[%s1528_s1 + $0xc0] sm:$0xff]   ;;  %v1214_v0 = vld [vmem:[%s1528_s1 + $0x110] sm:$0xff]  }
  0x38   : > { %v1195_v51 = vld [vmem:[%s1528_s1 + $0x8] sm:$0xff]   ;;  %v1199_v55 = vld [vmem:[%s1528_s1] sm:$0xff]   ;;  %v1217_v4 = vld [vmem:[%s1367_s29 + $0x5c] ss:$20 sps:$4 sm:$0xff]  }
  0x39   : > { %1034 = vmatpush3.bf16.msra.mxu0 %v1179_v35  ;;  %v1196_v52 = vld [vmem:[%s1528_s1 + $0x88] sm:$0xff]   ;;  %v1200_v56 = vld [vmem:[%s1528_s1 + $0x80] sm:$0xff]   ;;  %v1222_v9 = vld [vmem:[%s1367_s29 + $0x7c] ss:$20 sps:$4 sm:$0xff]  }
  0x3a   : > { %1074 = vmatpush3.bf16.msra.mxu1 %v1180_v36  ;;  %1035 = vmatprep.subr.bf16.mxu0 %v1181_v37  ;;  %v1201_v57 = vld [vmem:[%s1367_s29] ss:$20 sps:$4 sm:$0xff]   ;;  %v1203_v58 = vld [vmem:[%s1367_s29 + $0x4] ss:$20 sps:$4 sm:$0xff]   ;;  %v1204_v59 = vld [vmem:[%s1367_s29 + $0x8] ss:$20 sps:$4 sm:$0xff]  }
  0x3b   : > { %1075 = vmatprep.subr.bf16.mxu1 %v1182_v38  ;;  %v1206_v60 = vld [vmem:[%s1367_s29 + $0xc] ss:$20 sps:$4 sm:$0xff]   ;;  %696 = vmatprep.mubr.bf16.mxu0 %v1203_v58  ;;  %v1210_v63 = vld [vmem:[%s1367_s29 + $0x34] ss:$20 sps:$4 sm:$0xff]   ;;  %v1213_v2 = vld [vmem:[%s1367_s29 + $0x30] ss:$20 sps:$4 sm:$0xff]  }
  0x3c   : > { %761 = vmatprep.mubr.bf16.mxu1 %v1206_v60  ;;  %v1208_v62 = vld [vmem:[%s1367_s29 + $0x2c] ss:$20 sps:$4 sm:$0xff]   ;;  %v1212_v1 = vld [vmem:[%s1367_s29 + $0x28] ss:$20 sps:$4 sm:$0xff]   ;;  %v1219_v7 = vld [vmem:[%s1367_s29 + $0x50] ss:$20 sps:$4 sm:$0xff]  }
  0x3d   : > { %1036 = vmatpush3.bf16.msra.mxu0 %v1183_v39  ;;  %v1215_v3 = vld [vmem:[%s1367_s29 + $0x54] ss:$20 sps:$4 sm:$0xff]   ;;  %v1228_v6 = vld [vmem:[%s1528_s1 + $0x100] sm:$0xff]   ;;  %v1220_v8 = vld [vmem:[%s1367_s29 + $0x58] ss:$20 sps:$4 sm:$0xff]  }
  0x3e   : > { %1076 = vmatpush3.bf16.msra.mxu1 %v1184_v40  ;;  %1037 = vmatprep.subr.bf16.mxu0 %v1185_v41  ;;  %v1221_v5 = vld [vmem:[%s1528_s1 + $0x108] sm:$0xff]   ;;  %v1224_v10 = vld [vmem:[%s1367_s29 + $0x84] ss:$20 sps:$4 sm:$0xff]   ;;  %v1227_v12 = vld [vmem:[%s1367_s29 + $0x80] ss:$20 sps:$4 sm:$0xff]  }
  0x3f   : > { %1077 = vmatprep.subr.bf16.mxu1 %v1186_v42  ;;  %v1226_v11 = vld [vmem:[%s1367_s29 + $0x78] ss:$20 sps:$4 sm:$0xff]   ;;  %v1229_v13 = vld [vmem:[%s1367_s29 + $0x10] ss:$20 sps:$4 sm:$0xff]   ;;  %v1230_v14 = vld [vmem:[%s1367_s29 + $0x60] ss:$20 sps:$4 sm:$0xff]  }
  0x40   : > { %v1231_v15 = vld [vmem:[%s1367_s29 + $0x38] ss:$20 sps:$4 sm:$0xff]   ;;  %v1232_v16 = vld [vmem:[%s1367_s29 + $0x88] ss:$20 sps:$4 sm:$0xff]  }
  0x41   : > { %1038 = vmatpush3.bf16.msra.mxu0 %v1187_v43 }
  0x42   : > { %1078 = vmatpush3.bf16.msra.mxu1 %v1188_v44  ;;  %1039 = vmatprep.subr.bf16.mxu0 %v1189_v45 }
  0x43   : > { %1079 = vmatprep.subr.bf16.mxu1 %v1190_v46 }
  0x45   : > { %1040 = vmatpush3.bf16.msra.mxu0 %v1191_v47 }
  0x46   : > { %1080 = vmatpush3.bf16.msra.mxu1 %v1192_v48  ;;  %1041 = vmatprep.subr.bf16.mxu0 %v1193_v49 }
  0x47   : > { %1081 = vmatprep.subr.bf16.mxu1 %v1194_v50 }
  0x49   : > { %1042 = vmatpush3.bf16.msra.mxu0 %v1195_v51 }
  0x4a   : > { %1082 = vmatpush3.bf16.msra.mxu1 %v1196_v52  ;;  %1043 = vmatprep.subr.bf16.mxu0 %v1197_v53 }
  0x4b   : > { %1083 = vmatprep.subr.bf16.mxu1 %v1198_v54 }
  0x4d   : > { %1044 = vmatpush3.bf16.msra.mxu0 %v1199_v55 }
  0x4e   : > { %1084 = vmatpush3.bf16.msra.mxu1 %v1200_v56  ;;  %1117 = vmatprep.subr.bf16.mxu0 %v1207_v61 }
  0x4f   : > { %1133 = vmatprep.subr.bf16.mxu1 %v1207_v61 }
  0x50   : > { %697 = vmatmul.mubr.bf16.vlgmr.msra.gmra.mxu0 %v1201_v57 }
  0x51   : > { %762 = vmatmul.mubr.bf16.vlgmr.msra.gmra.mxu1 %v1204_v59  ;;  %1118 = vmatpush3.bf16.msra.mxu0 %v1207_v61 }
  0x52   : > { %704 = vmatprep.mubr.bf16.mxu0 %v1208_v62  ;;  %769 = vmatprep.mubr.bf16.mxu1 %v1210_v63 }
  0x53   : > { %1137 = vmatpush3.bf16.msra.mxu1 %v1207_v61  ;;  %1119 = vmatprep.subr.bf16.mxu0 %v1214_v0 }
  0x54   : > { %1134 = vmatprep.subr.bf16.mxu1 %v1214_v0 }
  0x55   : > { %1120 = vmatpush3.bf16.msra.mxu0 %v1214_v0 }
  0x56   : > { %1121 = vmatprep.subr.bf16.mxu0 %v1221_v5 }
  0x57   : > { %1138 = vmatpush3.bf16.msra.mxu1 %v1214_v0 }
  0x58   : > { %705 = vmatmul.mubr.bf16.gmra.mxu0 %v1212_v1  ;;  %1135 = vmatprep.subr.bf16.mxu1 %v1221_v5 }
  0x59   : > { %770 = vmatmul.mubr.bf16.gmra.mxu1 %v1213_v2  ;;  %712 = vmatprep.mubr.bf16.mxu0 %v1215_v3 }
  0x5a   : > { %777 = vmatprep.mubr.bf16.mxu1 %v1217_v4  ;;  %1122 = vmatpush3.bf16.msra.mxu0 %v1221_v5 }
  0x5b   : > { %1123 = vmatprep.subr.bf16.mxu0 %v1228_v6  ;;  %1139 = vmatpush3.bf16.msra.mxu1 %v1221_v5 }
  0x5c   : > { %1136 = vmatprep.subr.bf16.mxu1 %v1228_v6 }
  0x5e   : > { %1124 = vmatpush3.bf16.msra.mxu0 %v1228_v6 }
  0x5f   : > { %1140 = vmatpush3.bf16.msra.mxu1 %v1228_v6 }
  0x60   : > { %713 = vmatmul.mubr.bf16.gmra.mxu0 %v1219_v7 }
  0x61   : > { %778 = vmatmul.mubr.bf16.gmra.mxu1 %v1220_v8  ;;  %720 = vmatprep.mubr.bf16.mxu0 %v1222_v9 }
  0x62   : > { %785 = vmatprep.mubr.bf16.mxu1 %v1224_v10 }
  0x68   : > { %721 = vmatmul.mubr.bf16.gmra.mxu0 %v1226_v11 }
  0x69   : > { %786 = vmatmul.mubr.bf16.gmra.mxu1 %v1227_v12  ;;  %1125 = vmatprep.mubr.msk.bf16.mxu0 %vm651_vm0, %v1229_v13 }
  0x6a   : > { %1129 = vmatprep.mubr.msk.bf16.mxu1 %vm651_vm0, %v1230_v14 }
  0x70   : > { %1126 = vmatmul.mubr.msk.bf16.vlgmr.msra.gmra.mxu0 %vm651_vm0, %v1231_v15 }
  0x71   : > { %1130 = vmatmul.mubr.msk.bf16.vlgmr.msra.gmra.mxu1 %vm651_vm0, %v1232_v16 }
 0x110   : > { %v1045_v17 = vpop.f32.mrf.mxu0 }
 0x111   : > { %v1085_v18 = vpop.f32.mrf.mxu1 }
 0x112   : > { %v1046_v19 = vpop.f32.mrf.mxu0 }
 0x113   : > { %v1086_v20 = vpop.f32.mrf.mxu1  ;;  %v1047_v48 = vadd.f32 %v1046_v19, %v1045_v17 }
 0x114   : > { %v1048_v21 = vpop.f32.mrf.mxu0  ;;  %v1087_v49 = vadd.f32 %v1086_v20, %v1085_v18 }
 0x115   : > { %v1088_v22 = vpop.f32.mrf.mxu1 }
 0x116   : > { %v1049_v23 = vpop.f32.mrf.mxu0  ;;  %v764_v60 = vadd.f32 %v1087_v49, %v1047_v48 }
 0x117   : > { %v1089_v24 = vpop.f32.mrf.mxu1  ;;  %v1050_v52 = vadd.f32 %v1049_v23, %v1048_v21 }
 0x118   : > { %v1051_v25 = vpop.f32.mrf.mxu0  ;;  %v1090_v53 = vadd.f32 %v1089_v24, %v1088_v22 }
 0x119   : > { %v1091_v26 = vpop.f32.mrf.mxu1 }
 0x11a   : > { %v1052_v27 = vpop.f32.mrf.mxu0  ;;  %v767_v3 = vadd.f32 %v1090_v53, %v1050_v52 }
 0x11b   : > { %v1092_v28 = vpop.f32.mrf.mxu1  ;;  %v1053_v54 = vadd.f32 %v1052_v27, %v1051_v25 }
 0x11c   : > { %v1054_v29 = vpop.f32.mrf.mxu0  ;;  %v1093_v55 = vadd.f32 %v1092_v28, %v1091_v26 }
 0x11d   : > { %v1094_v30 = vpop.f32.mrf.mxu1 }
 0x11e   : > { %v1055_v31 = vpop.f32.mrf.mxu0  ;;  %v772_v1 = vadd.f32 %v1093_v55, %v1053_v54 }
 0x11f   : > { %v1095_v32 = vpop.f32.mrf.mxu1  ;;  %v1056_v58 = vadd.f32 %v1055_v31, %v1054_v29 }
 0x120   : > { %v1057_v33 = vpop.f32.mrf.mxu0  ;;  %v1096_v59 = vadd.f32 %v1095_v32, %v1094_v30 }
 0x121   : > { %v1097_v34 = vpop.f32.mrf.mxu1 }
 0x122   : > { %v1058_v35 = vpop.f32.mrf.mxu0  ;;  %v775_v9 = vadd.f32 %v1096_v59, %v1056_v58  ;;  %v875_v59 = vld [vmem:[%s1530_s3] sm:$0x1] }
 0x123   : > { %v1098_v36 = vpop.f32.mrf.mxu1  ;;  %v1059_v62 = vadd.f32 %v1058_v35, %v1057_v33 }
 0x124   : > { %v1060_v37 = vpop.f32.mrf.mxu0  ;;  %v1099_v63 = vadd.f32 %v1098_v36, %v1097_v34 }
 0x125   : > { %v1100_v38 = vpop.f32.mrf.mxu1 }
 0x126   : > { %v1061_v39 = vpop.f32.mrf.mxu0  ;;  %v780_v13 = vadd.f32 %v1099_v63, %v1059_v62 }
 0x127   : > { %v1101_v40 = vpop.f32.mrf.mxu1  ;;  %v1062_v4 = vadd.f32 %v1061_v39, %v1060_v37 }
 0x128   : > { %v1063_v41 = vpop.f32.mrf.mxu0  ;;  %v1102_v5 = vadd.f32 %v1101_v40, %v1100_v38 }
 0x129   : > { %v1103_v42 = vpop.f32.mrf.mxu1 }
 0x12a   : > { %v1064_v43 = vpop.f32.mrf.mxu0  ;;  %v783_v20 = vadd.f32 %v1102_v5, %v1062_v4 }
 0x12b   : > { %v1104_v44 = vpop.f32.mrf.mxu1  ;;  %v1065_v11 = vadd.f32 %v1064_v43, %v1063_v41 }
 0x12c   : > { %v1066_v45 = vpop.f32.mrf.mxu0  ;;  %v1105_v12 = vadd.f32 %v1104_v44, %v1103_v42 }
 0x12d   : > { %v1106_v46 = vpop.f32.mrf.mxu1 }
 0x12e   : > { %v1067_v47 = vpop.f32.mrf.mxu0  ;;  %v788_v26 = vadd.f32 %v1105_v12, %v1065_v11 }
 0x12f   : > { %v1107_v50 = vpop.f32.mrf.mxu1  ;;  %v1068_v18 = vadd.f32 %v1067_v47, %v1066_v45 }
 0x130   : > { %v1127_v51 = vpop.f32.mrf.mxu0  ;;  %v1108_v19 = vadd.f32 %v1107_v50, %v1106_v46 }
 0x131   : > { %v1131_v56 = vpop.f32.mrf.mxu1  ;;  %v837_v8 = vadd.f32 %v1127_v51, %v772_v1 }
 0x132   : > { %v828_v57 = vpop.f32.mrf.mxu0  ;;  %v853_v31 = vadd.f32 %v1131_v56, %v788_v26  ;;  %v791_v33 = vadd.f32 %v1108_v19, %v1068_v18  ;;  %v859_v56 = vld [vmem:[%s1529_s2] sm:$0x1] }
 0x133   : > { %v844_v61 = vpop.f32.mrf.mxu1  ;;  %v829_v2 = vadd.f32 %v828_v57, %v764_v60  ;;  %v878_v22 = vmul.f32 %v837_v8, %v837_v8 }
 0x134   : > { %v1128_v0 = vpop.f32.mrf.mxu0  ;;  %v845_v23 = vadd.f32 %v844_v61, %v780_v13  ;;  %v882_v40 = vmul.f32 %v853_v31, %v853_v31 }
 0x135   : > { %v1132_v6 = vpop.f32.mrf.mxu1  ;;  %v876_v14 = vmul.f32 %v829_v2, %v829_v2  ;;  %v840_v15 = vadd.f32 %v1128_v0, %v775_v9 }
 0x136   : > { %v831_v7 = vpop.f32.mrf.mxu0  ;;  %v880_v32 = vmul.f32 %v845_v23, %v845_v23  ;;  %v856_v36 = vadd.f32 %v1132_v6, %v791_v33 }
 0x137   : > { %v832_v10 = vadd.f32 %v831_v7, %v767_v3  ;;  %v847_v21 = vpop.f32.mrf.mxu1  ;;  %v879_v27 = vmul.f32 %v840_v15, %v840_v15 }
 0x138   : > { %v848_v29 = vadd.f32 %v847_v21, %v783_v20  ;;  %v883_v43 = vmul.f32 %v856_v36, %v856_v36 }
 0x139   : > { %v860_v16 = vadd.f32 %v832_v10, %v829_v2  ;;  %v877_v17 = vmul.f32 %v832_v10, %v832_v10 }
 0x13a   : > { %v881_v38 = vmul.f32 %v848_v29, %v848_v29 }
 0x13b   : > { %v861_v24 = vadd.f32 %v860_v16, %v837_v8  ;;  %v884_v25 = vadd.f32 %v877_v17, %v876_v14 }
 0x13d   : > { %v885_v28 = vadd.f32 %v884_v25, %v878_v22  ;;  %v862_v30 = vadd.f32 %v861_v24, %v840_v15 }
 0x13f   : > { %v863_v34 = vadd.f32 %v862_v30, %v845_v23  ;;  %v886_v35 = vadd.f32 %v885_v28, %v879_v27 }
 0x141   : > { %v864_v37 = vadd.f32 %v863_v34, %v848_v29  ;;  %v887_v39 = vadd.f32 %v886_v35, %v880_v32 }
 0x143   : > { %v865_v41 = vadd.f32 %v864_v37, %v853_v31  ;;  %v888_v42 = vadd.f32 %v887_v39, %v881_v38 }
 0x145   : > { %v866_v44 = vadd.f32 %v865_v41, %v856_v36  ;;  %v889_v45 = vadd.f32 %v888_v42, %v882_v40 }
 0x147   : > { %v867_v46 = vrot.slane %v866_v44, 4  ;;  %v890_v47 = vadd.f32 %v889_v45, %v883_v43 }
 0x149   : > { %v868_v48 = vadd.f32 %v867_v46, %v866_v44  ;;  %v891_v49 = vrot.slane %v890_v47, 4 }
 0x14b   : > { %v869_v50 = vrot.slane %v868_v48, 2  ;;  %v892_v51 = vadd.f32 %v891_v49, %v890_v47 }
 0x14d   : > { %v870_v52 = vadd.f32 %v869_v50, %v868_v48  ;;  %v893_v53 = vrot.slane %v892_v51, 2 }
 0x14f   : > { %v871_v54 = vrot.slane %v870_v52, 1  ;;  %v894_v55 = vadd.f32 %v893_v53, %v892_v51 }
 0x151   : > { %v872_v57 = vadd.f32 %v871_v54, %v870_v52  ;;  %v895_v58 = vrot.slane %v894_v55, 1 }
 0x153   : > { %v873_v60 = vadd.f32 %v872_v57, %v859_v56  ;;  %v896_v61 = vadd.f32 %v895_v58, %v894_v55 }
 0x155   : > { %874 = vst [vmem:[%s1529_s2] sm:$0x1] %v873_v60  ;;  %v897_v62 = vadd.f32 %v896_v61, %v875_v59 }
 0x157   : > { %898 = vst [vmem:[%s1530_s3] sm:$0x1] %v897_v62 }
 0x158 PF: > { %p11_p9 = scmp.ge.s32.totalorder %s1295_s16, 4   ;;  %s1531_s12 = smov %s1251_s13 }
 0x159   : > { %s1532_s13 = smov %s1304_s19  ;;  %s1533_s14 = smov %s1295_s16 }
 0x15a   :  { %13 = sbr.rel (!%p11_p9) target bundleno = 2 (0x2), region = 103 }

// kernel: neg.18
= control target key start
LH: loop header
LB: loop body
LE: loop exit
PB: predicated region body
PF: predicated region fallthrough
CT: control target
= control target key end

     0   :  { %s24_s0 = inlined_call_operand.vmem [shape: f32[9,1], index: 0, kind: input, shape index: {}]   ;;  %s25_s1 = inlined_call_operand.vmem [shape: f32[9,1], index: 1, kind: output, shape index: {}]  }
   0x1   :  { %v2_v0 = vld [vmem:[%s24_s0] sm:$0x1] }
   0x2   :  { %v5_v1 = vxor.u32 2147483648, %v2_v0 }
   0x4   :  { %7 = vst [vmem:[%s25_s1] sm:$0x1] %v5_v1 }

// kernel: text_detection_forward.7
= control target key start
LH: loop header
LB: loop body
LE: loop exit
PB: predicated region body
PF: predicated region fallthrough
CT: control target
= control target key end

     0   :  { %s3290_s25 = smov 0   ;;  %s3292_s26 = smov 0   ;;  %s4033_s0 = inlined_call_operand.vmem [shape: bf16[4,32,576], index: 0, kind: input, shape index: {}]   ;;  %s4034_s1 = inlined_call_operand.vmem [shape: bf16[576,128], index: 1, kind: input, shape index: {}]   ;;  %s4035_s2 = inlined_call_operand.vmem [shape: f32[1,128], index: 2, kind: input, shape index: {}]   ;;  %s4036_s3 = inlined_call_operand.vmem [shape: f32[1,128], index: 3, kind: input, shape index: {}]   ;;  %s4037_s4 = inlined_call_operand.vmem [shape: f32[1,128], index: 4, kind: input, shape index: {}]   ;;  %s4038_s5 = inlined_call_operand.vmem [shape: f32[1,128], index: 5, kind: input, shape index: {}]   ;;  %s4039_s6 = inlined_call_operand.vmem [shape: bf16[64,256], index: 6, kind: input, shape index: {}]   ;;  %s4040_s7 = inlined_call_operand.vmem [shape: bf16[128,256], index: 7, kind: input, shape index: {}]   ;;  %s4041_s8 = inlined_call_operand.vmem [shape: f32[1,256], index: 8, kind: input, shape index: {}]   ;;  %s4042_s9 = inlined_call_operand.vmem [shape: bf16[256,512], index: 9, kind: input, shape index: {}]   ;;  %s4043_s10 = inlined_call_operand.vmem [shape: f32[1,512], index: 10, kind: input, shape index: {}]   ;;  %s4044_s11 = inlined_call_operand.vmem [shape: bf16[512,256], index: 11, kind: input, shape index: {}]   ;;  %s4045_s12 = inlined_call_operand.vmem [shape: f32[1,256], index: 12, kind: input, shape index: {}]   ;;  %s4046_s13 = inlined_call_operand.vmem [shape: f32[32,256], index: 13, kind: output, shape index: {}]  }
   0x1   :  { %s3294_s27 = smov 0  }
   0x2 LB: > { %s2530_s28 = sadd.s32 4294967295, %s3217_s27   ;;  %s3307_s29 = sadd.s32 1, %s3217_s27   ;;  %s3217_s27 = sphi %s3294_s27, %s4049_s27   ;;  %s3213_s26 = sphi %s3292_s26, %s4048_s26   ;;  %s3209_s25 = sphi %s3290_s25, %s4047_s25  }
   0x3   : > { %s27_s30 = ssub.s32 %s3217_s27, %s3307_s29  ;;  %s30_s14 = sadd.s32 1, %s3213_s26 }
   0x4   : > { %p28_p0 = scmp.eq.s32.totalorder %s27_s30, 0  ;;  %p37_p1 = scmp.ne.s32.totalorder %s3213_s26, %s3209_s25 }
   0x5   : > { %p38_p2 = scmp.eq.s32.totalorder %s3217_s27, 0  ;;  %p2533_p4 = scmp.ge.s32.totalorder %s3217_s27, 2 }
   0x6   : > { %s3316_s15 = scalar_select %p28_p0, %s3213_s26, %s30_s14  }
   0x7   : > { %p39_p3 = por %p38_p2, %p37_p1  ;;  %377 = sbr.rel (%p2533_p4) target bundleno = 30 (0x1e), region = 64 }
   0xc   : > { %380 = sbr.rel (!%p39_p3) target bundleno = 30 (0x1e), region = 68  ;;  %s382_s16 = sand.u32 (%p39_p3), 1, %s3213_s26  }
   0xd   : > { %s2878_s17 = smul.u32 (%p39_p3), 40, %s3217_s27 }
   0xe   : > { %s2877_s18 = smul.u32 (%p39_p3), 160, %s382_s16 }
   0xf   : > { %s3324_s21 = scalar_lea.vmem (%p39_p3), %s4033_s0, %s2878_s17 }
  0x10   : > { %v403_v0 = vld [vmem:[%s3324_s21] sm:$0xff] (%p39_p3)  ;;  %v405_v1 = vld [vmem:[%s3324_s21 + $0x8] sm:$0xff] (%p39_p3)  ;;  %v407_v2 = vld [vmem:[%s3324_s21 + $0x14] sm:$0xff] (%p39_p3)  ;;  %s3329_s22 = scalar_lea.vmem (%p39_p3), [#allocation2], %s2877_s18 }
  0x11   : > { %404 = vst [vmem:[%s3329_s22] sm:$0xff] %v403_v0  ;;  %406 = vst [vmem:[%s3329_s22 + $0x8] sm:$0xff] %v405_v1  ;;  %v409_v3 = vld [vmem:[%s3324_s21 + $0x1c] sm:$0xff]  ;;  %v411_v4 = vld [vmem:[%s3324_s21 + $0x50] sm:$0xff] }
  0x12   : > { %408 = vst [vmem:[%s3329_s22 + $0x14] sm:$0xff] %v407_v2  ;;  %v413_v5 = vld [vmem:[%s3324_s21 + $0x58] sm:$0xff]  ;;  %410 = vst [vmem:[%s3329_s22 + $0x1c] sm:$0xff] %v409_v3  ;;  %v415_v6 = vld [vmem:[%s3324_s21 + $0x64] sm:$0xff] }
  0x13   : > { %412 = vst [vmem:[%s3329_s22 + $0x28] sm:$0xff] %v411_v4  ;;  %414 = vst [vmem:[%s3329_s22 + $0x30] sm:$0xff] %v413_v5  ;;  %v417_v7 = vld [vmem:[%s3324_s21 + $0x6c] sm:$0xff]  ;;  %v419_v8 = vld [vmem:[%s3324_s21 + $0xa0] sm:$0xff] }
  0x14   : > { %416 = vst [vmem:[%s3329_s22 + $0x3c] sm:$0xff] %v415_v6  ;;  %418 = vst [vmem:[%s3329_s22 + $0x44] sm:$0xff] %v417_v7  ;;  %v421_v9 = vld [vmem:[%s3324_s21 + $0xa8] sm:$0xff]  ;;  %v423_v10 = vld [vmem:[%s3324_s21 + $0xb4] sm:$0xff] }
  0x15   : > { %420 = vst [vmem:[%s3329_s22 + $0x50] sm:$0xff] %v419_v8  ;;  %v425_v11 = vld [vmem:[%s3324_s21 + $0xbc] sm:$0xff]  ;;  %422 = vst [vmem:[%s3329_s22 + $0x58] sm:$0xff] %v421_v9  ;;  %v427_v12 = vld [vmem:[%s3324_s21 + $0xf0] sm:$0xff] }
  0x16   : > { %424 = vst [vmem:[%s3329_s22 + $0x64] sm:$0xff] %v423_v10  ;;  %426 = vst [vmem:[%s3329_s22 + $0x6c] sm:$0xff] %v425_v11  ;;  %v429_v13 = vld [vmem:[%s3324_s21 + $0xf8] sm:$0xff]  ;;  %v431_v14 = vld [vmem:[%s3324_s21 + $0x104] sm:$0xff] }
  0x17   : > { %428 = vst [vmem:[%s3329_s22 + $0x78] sm:$0xff] %v427_v12  ;;  %430 = vst [vmem:[%s3329_s22 + $0x80] sm:$0xff] %v429_v13  ;;  %v433_v15 = vld [vmem:[%s3324_s21 + $0x10c] sm:$0xff]  ;;  %v2539_v17 = vld [vmem:[%s3324_s21 + $0x24] sm:$0xf] }
  0x18   : > { %432 = vst [vmem:[%s3329_s22 + $0x8c] sm:$0xff] %v431_v14  ;;  %v2537_v16 = vld [vmem:[%s3324_s21 + $0x10] sm:$0xf]  ;;  %434 = vst [vmem:[%s3329_s22 + $0x94] sm:$0xff] %v433_v15  ;;  %v2541_v18 = vld [vmem:[%s3324_s21 + $0x60] sm:$0xf] }
  0x19   : > { %2538 = vst [vmem:[%s3329_s22 + $0x10] sm:$0xf] %v2537_v16  ;;  %2540 = vst [vmem:[%s3329_s22 + $0x24] sm:$0xf] %v2539_v17  ;;  %v2543_v19 = vld [vmem:[%s3324_s21 + $0x74] sm:$0xf] }
  0x1a   : > { %v2545_v20 = vld [vmem:[%s3324_s21 + $0xb0] sm:$0xf]  ;;  %2542 = vst [vmem:[%s3329_s22 + $0x38] sm:$0xf] %v2541_v18  ;;  %2544 = vst [vmem:[%s3329_s22 + $0x4c] sm:$0xf] %v2543_v19 }
  0x1b   : > { %2546 = vst [vmem:[%s3329_s22 + $0x60] sm:$0xf] %v2545_v20  ;;  %v2547_v21 = vld [vmem:[%s3324_s21 + $0xc4] sm:$0xf]  ;;  %v2549_v22 = vld [vmem:[%s3324_s21 + $0x100] sm:$0xf] }
  0x1c   : > { %v2551_v23 = vld [vmem:[%s3324_s21 + $0x114] sm:$0xf]  ;;  %2548 = vst [vmem:[%s3329_s22 + $0x74] sm:$0xf] %v2547_v21  ;;  %2550 = vst [vmem:[%s3329_s22 + $0x88] sm:$0xf] %v2549_v22 }
  0x1d   : > { %2552 = vst [vmem:[%s3329_s22 + $0x9c] sm:$0xf] %v2551_v23 }
  0x1e PF: > { %p2553_p5 = scmp.ge.s32.totalorder %s3217_s27, 1  ;;  %p463_p6 = scmp.lt.s32.totalorder %s3217_s27, 3 }
  0x20   : > { %p464_p7 = pnand %p2553_p5, %p463_p6 }
  0x21   : > { %s470_s16 = sand.u32 (!%p464_p7), 1, %s3209_s25   ;;  %s2554_s30 = sshll.u32 (!%p464_p7), %s2530_s28, 1 }
  0x22   : > { %467 = sbr.rel (%p464_p7) target bundleno = 944 (0x3b0), region = 94  ;;  %p516_p8 = scmp.lt.s32.totalorder (!%p464_p7), %s2554_s30, 3 }
  0x23   : > { %s2879_s23 = smul.u32 (!%p464_p7), 160, %s470_s16 }
  0x25   : > { %s3475_s22 = scalar_lea.vmem (!%p464_p7), [#allocation2], %s2879_s23 }
  0x27   : > { %v2905_v24 = vld [vmem:[%s4034_s1 + $0x78] sm:$0xff]   ;;  %v2909_v28 = vld [vmem:[%s4034_s1 + $0x70] sm:$0xff]   ;;  %v2913_v32 = vld [vmem:[%s4034_s1 + $0x68] sm:$0xff]   ;;  %vm935_vm0 = vcmask 523264   ;;  %s4051_s30 = smov (!%p516_p8, %s2554_s30), 3 }
  0x28   : > { %v2906_v25 = vld [vmem:[%s4034_s1 + $0xf8] sm:$0xff]   ;;  %2773 = vmatprep.subr.bf16.mxu0 %v2905_v24  ;;  %v2910_v29 = vld [vmem:[%s4034_s1 + $0xf0] sm:$0xff]   ;;  %v2914_v33 = vld [vmem:[%s4034_s1 + $0xe8] sm:$0xff]   ;;  %s2772_s14 = sshll.u32 %s4051_s30, 4 }
  0x29   : > { %v2907_v26 = vld [vmem:[%s4034_s1 + $0x38] sm:$0xff]   ;;  %2813 = vmatprep.subr.bf16.mxu1 %v2906_v25  ;;  %v2911_v30 = vld [vmem:[%s4034_s1 + $0x30] sm:$0xff]   ;;  %v2915_v34 = vld [vmem:[%s4034_s1 + $0x28] sm:$0xff]   ;;  %s520_s18 = scalar_lea.vmem %s4046_s13, %s2772_s14 }
  0x2a   : > { %v2908_v27 = vld [vmem:[%s4034_s1 + $0xb8] sm:$0xff]   ;;  %2774 = vmatpush3.bf16.msra.mxu0 %v2907_v26  ;;  %v2912_v31 = vld [vmem:[%s4034_s1 + $0xb0] sm:$0xff]   ;;  %v2916_v35 = vld [vmem:[%s4034_s1 + $0xa8] sm:$0xff]  }
  0x2b   : > { %2814 = vmatpush3.bf16.msra.mxu1 %v2908_v27  ;;  %2775 = vmatprep.subr.bf16.mxu0 %v2909_v28  ;;  %v2917_v36 = vld [vmem:[%s4034_s1 + $0x60] sm:$0xff]   ;;  %v2921_v40 = vld [vmem:[%s4034_s1 + $0x58] sm:$0xff]   ;;  %v2925_v44 = vld [vmem:[%s4034_s1 + $0x50] sm:$0xff]  }
  0x2c   : > { %2815 = vmatprep.subr.bf16.mxu1 %v2910_v29  ;;  %v2918_v37 = vld [vmem:[%s4034_s1 + $0xe0] sm:$0xff]   ;;  %v2922_v41 = vld [vmem:[%s4034_s1 + $0xd8] sm:$0xff]   ;;  %v2926_v45 = vld [vmem:[%s4034_s1 + $0xd0] sm:$0xff]  }
  0x2d   : > { %v2919_v38 = vld [vmem:[%s4034_s1 + $0x20] sm:$0xff]   ;;  %v2923_v42 = vld [vmem:[%s4034_s1 + $0x18] sm:$0xff]   ;;  %v2927_v46 = vld [vmem:[%s4034_s1 + $0x10] sm:$0xff]  }
  0x2e   : > { %2776 = vmatpush3.bf16.msra.mxu0 %v2911_v30  ;;  %v2920_v39 = vld [vmem:[%s4034_s1 + $0xa0] sm:$0xff]   ;;  %v2924_v43 = vld [vmem:[%s4034_s1 + $0x98] sm:$0xff]   ;;  %v2928_v47 = vld [vmem:[%s4034_s1 + $0x90] sm:$0xff]  }
  0x2f   : > { %2816 = vmatpush3.bf16.msra.mxu1 %v2912_v31  ;;  %2777 = vmatprep.subr.bf16.mxu0 %v2913_v32  ;;  %v2929_v48 = vld [vmem:[%s4034_s1 + $0x48] sm:$0xff]   ;;  %v2933_v52 = vld [vmem:[%s4034_s1 + $0x40] sm:$0xff]   ;;  %v2942_v62 = vld [vmem:[%s4034_s1 + $0x118] sm:$0xff]  }
  0x30   : > { %2817 = vmatprep.subr.bf16.mxu1 %v2914_v33  ;;  %v2930_v49 = vld [vmem:[%s4034_s1 + $0xc8] sm:$0xff]   ;;  %v2934_v53 = vld [vmem:[%s4034_s1 + $0xc0] sm:$0xff]   ;;  %v530_v2 = vld [vmem:[%s3475_s22 + $0x30] sm:$0xff] }
  0x31   : > { %v2931_v50 = vld [vmem:[%s4034_s1 + $0x8] sm:$0xff]   ;;  %v2935_v54 = vld [vmem:[%s4034_s1] sm:$0xff]   ;;  %v1201_v5 = vunpack.c.l.bf16 %v530_v2  ;;  %v2948_v7 = vld [vmem:[%s4034_s1 + $0x110] sm:$0xff]  }
  0x32   : > { %2778 = vmatpush3.bf16.msra.mxu0 %v2915_v34  ;;  %v2932_v51 = vld [vmem:[%s4034_s1 + $0x88] sm:$0xff]   ;;  %v2936_v55 = vld [vmem:[%s4034_s1 + $0x80] sm:$0xff]   ;;  %v536_v11 = vld [vmem:[%s3475_s22 + $0x58] sm:$0xff] }
  0x33   : > { %2818 = vmatpush3.bf16.msra.mxu1 %v2916_v35  ;;  %2779 = vmatprep.subr.bf16.mxu0 %v2917_v36  ;;  %v2937_v56 = vld [vmem:[%s3475_s22] ss:$20 sps:$4 sm:$0xff]   ;;  %v2939_v57 = vld [vmem:[%s3475_s22 + $0x4] ss:$20 sps:$4 sm:$0xff]   ;;  %v524_v58 = vld [vmem:[%s3475_s22 + $0x8] sm:$0xff]  ;;  %v1205_v13 = vunpack.c.l.bf16 %v536_v11 }
  0x34   : > { %2819 = vmatprep.subr.bf16.mxu1 %v2918_v37  ;;  %v527_v59 = vld [vmem:[%s3475_s22 + $0x1c] sm:$0xff]  ;;  %980 = vmatprep.mubr.bf16.mxu0 %v2939_v57  ;;  %v1199_v63 = vunpack.c.l.bf16 %v524_v58  ;;  %v533_v3 = vld [vmem:[%s3475_s22 + $0x44] sm:$0xff]  ;;  %v539_v12 = vld [vmem:[%s3475_s22 + $0x6c] sm:$0xff] }
  0x35   : > { %v2560_v60 = vcombine.high %v524_v58, %v527_v59  ;;  %v2559_v61 = vcombine.low %v524_v58, %v527_v59  ;;  %v1200_v0 = vunpack.c.l.bf16 %v527_v59  ;;  %v2943_v1 = vld [vmem:[%s3475_s22 + $0x2c] ss:$20 sps:$4 sm:$0xff]   ;;  %v2565_v4 = vcombine.high %v530_v2, %v533_v3  ;;  %v2946_v10 = vld [vmem:[%s3475_s22 + $0x28] ss:$20 sps:$4 sm:$0xff]   ;;  %v545_v22 = vld [vmem:[%s3475_s22 + $0x94] sm:$0xff] }
  0x36   : > { %2780 = vmatpush3.bf16.msra.mxu0 %v2919_v38  ;;  %v1202_v6 = vunpack.c.l.bf16 %v533_v3  ;;  %v1203_v8 = vadd.f32 %v1201_v5, %v1199_v63  ;;  %v1206_v14 = vunpack.c.l.bf16 %v539_v12  ;;  %v2954_v15 = vld [vmem:[%s4034_s1 + $0x108] sm:$0xff]   ;;  %v2564_v16 = vcombine.low %v530_v2, %v533_v3  ;;  %v542_v21 = vld [vmem:[%s3475_s22 + $0x80] sm:$0xff]  ;;  %v2955_v31 = vld [vmem:[%s3475_s22 + $0x7c] ss:$20 sps:$4 sm:$0xff]  }
  0x37   : > { %2820 = vmatpush3.bf16.msra.mxu1 %v2920_v39  ;;  %2781 = vmatprep.subr.bf16.mxu0 %v2921_v40  ;;  %v2949_v17 = vld [vmem:[%s3475_s22 + $0x54] ss:$20 sps:$4 sm:$0xff]   ;;  %v2570_v18 = vcombine.high %v536_v11, %v539_v12  ;;  %v1209_v23 = vunpack.c.l.bf16 %v542_v21  ;;  %v1210_v24 = vunpack.c.l.bf16 %v545_v22  ;;  %v2960_v25 = vld [vmem:[%s4034_s1 + $0x100] sm:$0xff]   ;;  %v2569_v32 = vcombine.low %v536_v11, %v539_v12  ;;  %v2958_v35 = vld [vmem:[%s3475_s22 + $0x78] ss:$20 sps:$4 sm:$0xff]  }
  0x38   : > { %2821 = vmatprep.subr.bf16.mxu1 %v2922_v41  ;;  %1045 = vmatprep.mubr.bf16.mxu1 %v2560_v60  ;;  %v1204_v9 = vadd.f32 %v1202_v6, %v1200_v0  ;;  %v1207_v19 = vadd.f32 %v1205_v13, %v1203_v8  ;;  %v2952_v28 = vld [vmem:[%s3475_s22 + $0x50] ss:$20 sps:$4 sm:$0xff]   ;;  %v2575_v34 = vcombine.high %v542_v21, %v545_v22  ;;  %v2962_v38 = vld [vmem:[%s3475_s22 + $0x38] ss:$20 sps:$4 sm:$0xff]   ;;  %v2963_v39 = vld [vmem:[%s3475_s22 + $0x60] ss:$20 sps:$4 sm:$0xff]  }
  0x39   : > { %v2961_v36 = vld [vmem:[%s3475_s22 + $0x10] ss:$20 sps:$4 sm:$0xff]   ;;  %v2574_v37 = vcombine.low %v542_v21, %v545_v22  ;;  %v2964_v40 = vld [vmem:[%s3475_s22 + $0x88] ss:$20 sps:$4 sm:$0xff]   ;;  %v3219_v63 = vmov 0  }
  0x3a   : > { %2782 = vmatpush3.bf16.msra.mxu0 %v2923_v42  ;;  %v1208_v20 = vadd.f32 %v1206_v14, %v1204_v9  ;;  %v1211_v26 = vadd.f32 %v1209_v23, %v1207_v19  ;;  %v2967_v41 = vld [vmem:[%s4040_s7 + $0x74] ss:$8 sps:$4 sm:$0xff]   ;;  %v2965_v42 = vld [vmem:[%s4040_s7 + $0x70] ss:$8 sps:$4 sm:$0xff]   ;;  %v2991_v57 = vld [vmem:[%s4040_s7 + $0x24] ss:$8 sps:$4 sm:$0xff]  }
  0x3b   : > { %2822 = vmatpush3.bf16.msra.mxu1 %v2924_v43  ;;  %2783 = vmatprep.subr.bf16.mxu0 %v2925_v44  ;;  %v2970_v43 = vld [vmem:[%s4040_s7 + $0x64] ss:$8 sps:$4 sm:$0xff]   ;;  %v2968_v44 = vld [vmem:[%s4040_s7 + $0x60] ss:$8 sps:$4 sm:$0xff]  }
  0x3c   : > { %2823 = vmatprep.subr.bf16.mxu1 %v2926_v45  ;;  %v1212_v27 = vadd.f32 %v1210_v24, %v1208_v20  ;;  %v3503_v29 = vmul.f32 0.25, %v1211_v26  ;;  %v2973_v45 = vld [vmem:[%s4040_s7 + $0x54] ss:$8 sps:$4 sm:$0xff]   ;;  %v2989_v58 = vld [vmem:[%s4040_s7 + $0x20] ss:$8 sps:$4 sm:$0xff]  }
  0x3d   : > { %v2994_v59 = vld [vmem:[%s4039_s6 + $0x4] ss:$8 sps:$4 sm:$0xff]   ;;  %v2992_v60 = vld [vmem:[%s4039_s6] ss:$8 sps:$4 sm:$0xff]  }
  0x3e   : > { %2784 = vmatpush3.bf16.msra.mxu0 %v2927_v46  ;;  %v3505_v30 = vmul.f32 0.25, %v1212_v27  ;;  %v2971_v46 = vld [vmem:[%s4040_s7 + $0x50] ss:$8 sps:$4 sm:$0xff]   ;;  %v3000_v0 = vld [vmem:[%s4040_s7 + $0x4] ss:$8 sps:$4 sm:$0xff]  }
  0x3f   : > { %2824 = vmatpush3.bf16.msra.mxu1 %v2928_v47  ;;  %2785 = vmatprep.subr.bf16.mxu0 %v2929_v48  ;;  %v2976_v47 = vld [vmem:[%s4039_s6 + $0x34] ss:$8 sps:$4 sm:$0xff]   ;;  %v2974_v48 = vld [vmem:[%s4039_s6 + $0x30] ss:$8 sps:$4 sm:$0xff]   ;;  %v1143_v26 = vld [vmem:[%s4035_s2] sm:$0x1] }
  0x40   : > { %2825 = vmatprep.subr.bf16.mxu1 %v2930_v49  ;;  %v1215_v33 = vpack.c.bf16 %v3505_v30, %v3503_v29  ;;  %v2979_v49 = vld [vmem:[%s4040_s7 + $0x44] ss:$8 sps:$4 sm:$0xff]   ;;  %v3004_v3 = vld [vmem:[%s4042_s9 + $0xe8] ss:$16 sps:$4 sm:$0xff]   ;;  %v1145_v29 = vld [vmem:[%s4036_s3] sm:$0x1] }
  0x41   : > { %v3003_v2 = vld [vmem:[%s4042_s9 + $0xe4] ss:$16 sps:$4 sm:$0xff]   ;;  %v3012_v5 = vld [vmem:[%s4042_s9 + $0xcc] ss:$16 sps:$4 sm:$0xff]   ;;  %v3010_v6 = vld [vmem:[%s4042_s9 + $0xc8] ss:$16 sps:$4 sm:$0xff]  }
  0x42   : > { %2786 = vmatpush3.bf16.msra.mxu0 %v2931_v50  ;;  %v2977_v50 = vld [vmem:[%s4040_s7 + $0x40] ss:$8 sps:$4 sm:$0xff]   ;;  %v3024_v9 = vld [vmem:[%s4042_s9 + $0x8c] ss:$16 sps:$4 sm:$0xff]  }
  0x43   : > { %2826 = vmatpush3.bf16.msra.mxu1 %v2932_v51  ;;  %2787 = vmatprep.subr.bf16.mxu0 %v2933_v52  ;;  %v2982_v51 = vld [vmem:[%s4039_s6 + $0x24] ss:$8 sps:$4 sm:$0xff]   ;;  %v2980_v52 = vld [vmem:[%s4039_s6 + $0x20] ss:$8 sps:$4 sm:$0xff]  }
  0x44   : > { %2827 = vmatprep.subr.bf16.mxu1 %v2934_v53  ;;  %v2985_v53 = vld [vmem:[%s4040_s7 + $0x34] ss:$8 sps:$4 sm:$0xff]   ;;  %v3016_v8 = vld [vmem:[%s4042_s9 + $0xa8] ss:$16 sps:$4 sm:$0xff]  }
  0x45   : > { %v3030_v11 = vld [vmem:[%s4042_s9 + $0x6c] ss:$16 sps:$4 sm:$0xff]   ;;  %v3028_v12 = vld [vmem:[%s4042_s9 + $0x68] ss:$16 sps:$4 sm:$0xff]  }
  0x46   : > { %2788 = vmatpush3.bf16.msra.mxu0 %v2935_v54  ;;  %v2983_v54 = vld [vmem:[%s4040_s7 + $0x30] ss:$8 sps:$4 sm:$0xff]   ;;  %v3036_v13 = vld [vmem:[%s4042_s9 + $0x4c] ss:$16 sps:$4 sm:$0xff]  }
  0x47   : > { %2828 = vmatpush3.bf16.msra.mxu1 %v2936_v55  ;;  %2861 = vmatprep.subr.bf16.mxu0 %v2942_v62  ;;  %v2988_v55 = vld [vmem:[%s4039_s6 + $0x14] ss:$8 sps:$4 sm:$0xff]   ;;  %v3034_v14 = vld [vmem:[%s4042_s9 + $0x48] ss:$16 sps:$4 sm:$0xff]  }
  0x48   : > { %1321 = vmatprep.subr.bf16.mxu1 %v2967_v41  ;;  %v3054_v19 = vld [vmem:[%s4042_s9 + $0x1ec] ss:$16 sps:$4 sm:$0xff]   ;;  %v3052_v20 = vld [vmem:[%s4042_s9 + $0x1e8] ss:$16 sps:$4 sm:$0xff]  }
  0x49   : > { %981 = vmatmul.mubr.bf16.vlgmr.msra.gmra.mxu0 %v2937_v56  ;;  %v2986_v56 = vld [vmem:[%s4039_s6 + $0x10] ss:$8 sps:$4 sm:$0xff]   ;;  %v3060_v21 = vld [vmem:[%s4042_s9 + $0x1cc] ss:$16 sps:$4 sm:$0xff]  }
  0x4a   : > { %1046 = vmatmul.mubr.bf16.vlgmr.msra.gmra.mxu1 %v2559_v61  ;;  %2862 = vmatpush3.bf16.msra.mxu0 %v2942_v62  ;;  %v2997_v61 = vld [vmem:[%s4040_s7 + $0x14] ss:$8 sps:$4 sm:$0xff]   ;;  %v2995_v62 = vld [vmem:[%s4040_s7 + $0x10] ss:$8 sps:$4 sm:$0xff]  }
  0x4b   : > { %988 = vmatprep.mubr.bf16.mxu0 %v2943_v1  ;;  %1053 = vmatprep.mubr.bf16.mxu1 %v2565_v4  ;;  %v2998_v1 = vld [vmem:[%s4040_s7] ss:$8 sps:$4 sm:$0xff]   ;;  %v3006_v4 = vld [vmem:[%s4042_s9 + $0xec] ss:$16 sps:$4 sm:$0xff]  }
  0x4c   : > { %2863 = vmatprep.subr.bf16.mxu0 %v2948_v7  ;;  %1322 = vmatpush1.bf16.msra.mxu1 %v2965_v42  ;;  %v3058_v22 = vld [vmem:[%s4042_s9 + $0x1c8] ss:$16 sps:$4 sm:$0xff]   ;;  %v3066_v23 = vld [vmem:[%s4042_s9 + $0x1ac] ss:$16 sps:$4 sm:$0xff]  }
  0x4d   : > { %1323 = vmatprep.subr.bf16.mxu1 %v2970_v43  ;;  %v3064_v24 = vld [vmem:[%s4042_s9 + $0x1a8] ss:$16 sps:$4 sm:$0xff]   ;;  %v3072_v27 = vld [vmem:[%s4042_s9 + $0x18c] ss:$16 sps:$4 sm:$0xff]  }
  0x4e   : > { %2864 = vmatpush3.bf16.msra.mxu0 %v2948_v7  ;;  %v3018_v7 = vld [vmem:[%s4042_s9 + $0xac] ss:$16 sps:$4 sm:$0xff]  }
  0x4f   : > { %2865 = vmatprep.subr.bf16.mxu0 %v2954_v15 }
  0x50   : > { %1324 = vmatpush1.bf16.msra.mxu1 %v2968_v44 }
  0x51   : > { %989 = vmatmul.mubr.bf16.gmra.mxu0 %v2946_v10  ;;  %1325 = vmatprep.subr.bf16.mxu1 %v2973_v45  ;;  %v3022_v10 = vld [vmem:[%s4042_s9 + $0x88] ss:$16 sps:$4 sm:$0xff]  }
  0x52   : > { %1054 = vmatmul.mubr.bf16.gmra.mxu1 %v2564_v16  ;;  %996 = vmatprep.mubr.bf16.mxu0 %v2949_v17  ;;  %v3040_v16 = vld [vmem:[%s4042_s9 + $0x28] ss:$16 sps:$4 sm:$0xff]   ;;  %v3048_v17 = vld [vmem:[%s4042_s9 + $0xc] ss:$16 sps:$4 sm:$0xff]  }
  0x53   : > { %1061 = vmatprep.mubr.bf16.mxu1 %v2570_v18  ;;  %2866 = vmatpush3.bf16.msra.mxu0 %v2954_v15  ;;  %v3042_v15 = vld [vmem:[%s4042_s9 + $0x2c] ss:$16 sps:$4 sm:$0xff]   ;;  %v3046_v18 = vld [vmem:[%s4042_s9 + $0x8] ss:$16 sps:$4 sm:$0xff]  }
  0x54   : > { %2867 = vmatprep.subr.bf16.mxu0 %v2960_v25  ;;  %1326 = vmatpush1.bf16.msra.mxu1 %v2971_v46 }
  0x55   : > { %1327 = vmatprep.subr.bf16.mxu1 %v2979_v49 }
  0x57   : > { %2868 = vmatpush3.bf16.msra.mxu0 %v2960_v25  ;;  %v3070_v25 = vld [vmem:[%s4042_s9 + $0x188] ss:$16 sps:$4 sm:$0xff]  }
  0x58   : > { %1415 = vmatprep.subr.bf16.mxu0 %v2976_v47  ;;  %1328 = vmatpush1.bf16.msra.mxu1 %v2977_v50 }
  0x59   : > { %997 = vmatmul.mubr.bf16.gmra.mxu0 %v2952_v28  ;;  %1329 = vmatprep.subr.bf16.mxu1 %v2985_v53  ;;  %v1144_v28 = vmul.f32 0.0078125, %v1143_v26 }
  0x5a   : > { %1062 = vmatmul.mubr.bf16.gmra.mxu1 %v2569_v32  ;;  %1004 = vmatprep.mubr.bf16.mxu0 %v2955_v31  ;;  %v1146_v31 = vmul.f32 0.0078125, %v1145_v29 }
  0x5b   : > { %1069 = vmatprep.mubr.bf16.mxu1 %v2575_v34  ;;  %v1147_v32 = vmul.f32 %v1144_v28, %v1144_v28 }
  0x5c   : > { %1330 = vmatpush1.bf16.msra.mxu1 %v2983_v54 }
  0x5d   : > { %1331 = vmatprep.subr.bf16.mxu1 %v2991_v57 }
  0x60   : > { %1332 = vmatpush1.bf16.msra.mxu1 %v2989_v58 }
  0x61   : > { %1005 = vmatmul.mubr.bf16.gmra.mxu0 %v2958_v35  ;;  %1333 = vmatprep.subr.bf16.mxu1 %v2997_v61 }
  0x62   : > { %1070 = vmatmul.mubr.bf16.gmra.mxu1 %v2574_v37  ;;  %2869 = vmatprep.mubr.msk.bf16.mxu0 %vm935_vm0, %v2961_v36  ;;  %v1148_v37 = vsub.f32 %v1146_v31, %v1147_v32 }
  0x63   : > { %1353 = vmatprep.mubr.bf16.mxu1 %v3219_v63 }
  0x64   : > { %1334 = vmatpush1.bf16.msra.mxu1 %v2995_v62  ;;  %v1149_v42 = vmax.f32 %v1148_v37, 0.0 }
  0x65   : > { %1335 = vmatprep.subr.bf16.mxu1 %v3000_v0  ;;  %v1158_v0 = vlaneseq }
  0x66   : > { %v1151_v47 = vadd.f32 1e-05, %v1149_v42 }
  0x68   : > { %1336 = vmatpush1.bf16.msra.mxu1 %v2998_v1  ;;  %3193 = vrsqrt.f32 %v1151_v47 }
  0x69   : > { %2870 = vmatmul.mubr.msk.bf16.vlgmr.msra.gmra.mxu0 %vm935_vm0, %v2962_v38  ;;  %1878 = vmatprep.subr.bf16.mxu1 %v3003_v2  ;;  %v1150_v2 = vld [vmem:[%s4037_s4] sm:$0x1] }
  0x6a   : > { %2873 = vmatprep.mubr.msk.bf16.mxu0 %vm935_vm0, %v2963_v39  ;;  %1416 = vmatpush1.bf16.msra.mxu0 %v2974_v48 }
  0x6b   : > { %1417 = vmatprep.subr.bf16.mxu0 %v2982_v51 }
  0x6e   : > { %1418 = vmatpush1.bf16.msra.mxu0 %v2980_v52 }
  0x6f   : > { %1419 = vmatprep.subr.bf16.mxu0 %v2988_v55 }
  0x71   : > { %2874 = vmatmul.mubr.msk.bf16.gmra.mxu0 %vm935_vm0, %v2964_v40 }
  0x72   : > { %1420 = vmatpush1.bf16.msra.mxu0 %v2986_v56  ;;  %1439 = vmatprep.mubr.bf16.mxu0 %v3219_v63 }
  0x73   : > { %1421 = vmatprep.subr.bf16.mxu0 %v2994_v59 }
  0x75   : > { %v3194_v1 = vpop.eup %3193 }
  0x76   : > { %1422 = vmatpush1.bf16.msra.mxu0 %v2992_v60 }
  0x77   : > { %1921 = vmatprep.subr.bf16.mxu0 %v3006_v4 }
  0x79   : > { %2641 = vmatmul.mubr.msk.bf16.vlgmr.msra.gmra.mxu0 %vm935_vm0, %v1215_v33 }
  0x7a   : > { %1922 = vmatpush1.bf16.msra.mxu0 %v3004_v3 }
  0x7b   : > { %1923 = vmatprep.subr.bf16.mxu0 %v3012_v5 }
  0x7e   : > { %1924 = vmatpush1.bf16.msra.mxu0 %v3010_v6 }
  0x7f   : > { %1925 = vmatprep.subr.bf16.mxu0 %v3018_v7 }
  0x82   : > { %1926 = vmatpush1.bf16.msra.mxu0 %v3016_v8  ;;  %v1153_v8 = vmul.f32 %v3194_v1, %v1150_v2 }
  0x83   : > { %1927 = vmatprep.subr.bf16.mxu0 %v3024_v9  ;;  %v3679_v9 = vshrl.u32 %v1158_v0, 7 }
  0x86   : > { %1928 = vmatpush1.bf16.msra.mxu0 %v3022_v10 }
  0x87   : > { %1929 = vmatprep.subr.bf16.mxu0 %v3030_v11 }
  0x8a   : > { %1930 = vmatpush1.bf16.msra.mxu0 %v3028_v12 }
  0x8b   : > { %1931 = vmatprep.subr.bf16.mxu0 %v3036_v13 }
  0x8e   : > { %1932 = vmatpush1.bf16.msra.mxu0 %v3034_v14 }
  0x8f   : > { %1933 = vmatprep.subr.bf16.mxu0 %v3042_v15 }
  0x92   : > { %1934 = vmatpush1.bf16.msra.mxu0 %v3040_v16 }
  0x93   : > { %1935 = vmatprep.subr.bf16.mxu0 %v3048_v17 }
  0x96   : > { %1936 = vmatpush1.bf16.msra.mxu0 %v3046_v18 }
  0x97   : > { %1937 = vmatprep.subr.bf16.mxu0 %v3054_v19 }
  0x9a   : > { %1938 = vmatpush2.bf16.msra.mxu0 %v3052_v20  ;;  %v1155_v20 = vmul.f32 %v1153_v8, %v1144_v28 }
  0x9b   : > { %1939 = vmatprep.subr.bf16.mxu0 %v3060_v21  ;;  %v3682_v21 = vsub.s32 0, %v3679_v9 }
  0x9e   : > { %1940 = vmatpush2.bf16.msra.mxu0 %v3058_v22 }
  0x9f   : > { %1941 = vmatprep.subr.bf16.mxu0 %v3066_v23 }
  0xa2   : > { %1942 = vmatpush2.bf16.msra.mxu0 %v3064_v24 }
  0xa3   : > { %1943 = vmatprep.subr.bf16.mxu0 %v3072_v27 }
  0xa6   : > { %1944 = vmatpush2.bf16.msra.mxu0 %v3070_v25  ;;  %v1154_v25 = vld [vmem:[%s4038_s5] sm:$0x1] }
  0xa7   : > { %v1156_v37 = vsub.f32 %v1154_v25, %v1155_v20  ;;  %v3007_v25 = vld [vmem:[%s4042_s9 + $0xc0] ss:$16 sps:$4 sm:$0xff]  }
 0x109   : > { %v2789_v30 = vpop.f32.mrf.mxu0 }
 0x10a   : > { %v2829_v33 = vpop.f32.mrf.mxu1 }
 0x10b   : > { %v2790_v34 = vpop.f32.mrf.mxu0 }
 0x10c   : > { %v2830_v35 = vpop.f32.mrf.mxu1  ;;  %v2791_v4 = vadd.f32 %v2790_v34, %v2789_v30 }
 0x10d   : > { %v2792_v36 = vpop.f32.mrf.mxu0  ;;  %v2831_v5 = vadd.f32 %v2830_v35, %v2829_v33 }
 0x10e   : > { %v2832_v38 = vpop.f32.mrf.mxu1 }
 0x10f   : > { %v2793_v39 = vpop.f32.mrf.mxu0  ;;  %v1048_v22 = vadd.f32 %v2831_v5, %v2791_v4 }
 0x110   : > { %v2833_v40 = vpop.f32.mrf.mxu1  ;;  %v2794_v10 = vadd.f32 %v2793_v39, %v2792_v36 }
 0x111   : > { %v2795_v41 = vpop.f32.mrf.mxu0  ;;  %v2834_v11 = vadd.f32 %v2833_v40, %v2832_v38  ;;  %v1161_v38 = vrot.slane %v1153_v8, %v3682_v21 }
 0x112   : > { %v2835_v43 = vpop.f32.mrf.mxu1 }
 0x113   : > { %v2796_v44 = vpop.f32.mrf.mxu0  ;;  %v1051_v26 = vadd.f32 %v2834_v11, %v2794_v10 }
 0x114   : > { %v2836_v45 = vpop.f32.mrf.mxu1  ;;  %v2797_v12 = vadd.f32 %v2796_v44, %v2795_v41 }
 0x115   : > { %v2798_v46 = vpop.f32.mrf.mxu0  ;;  %v2837_v13 = vadd.f32 %v2836_v45, %v2835_v43 }
 0x116   : > { %v2838_v48 = vpop.f32.mrf.mxu1 }
 0x117   : > { %v2799_v49 = vpop.f32.mrf.mxu0  ;;  %v1056_v24 = vadd.f32 %v2837_v13, %v2797_v12 }
 0x118   : > { %v2839_v50 = vpop.f32.mrf.mxu1  ;;  %v2800_v14 = vadd.f32 %v2799_v49, %v2798_v46 }
 0x119   : > { %v2801_v51 = vpop.f32.mrf.mxu0  ;;  %v2840_v15 = vadd.f32 %v2839_v50, %v2838_v48 }
 0x11a   : > { %v2841_v52 = vpop.f32.mrf.mxu1 }
 0x11b   : > { %v2802_v53 = vpop.f32.mrf.mxu0  ;;  %v1059_v31 = vadd.f32 %v2840_v15, %v2800_v14 }
 0x11c   : > { %v2842_v54 = vpop.f32.mrf.mxu1  ;;  %v2803_v27 = vadd.f32 %v2802_v53, %v2801_v51  ;;  %v1175_v51 = vrot.slane %v1156_v37, %v3682_v21  ;;  %v3043_v37 = vld [vmem:[%s4042_s9] ss:$16 sps:$4 sm:$0xff]  }
 0x11d   : > { %v2804_v55 = vpop.f32.mrf.mxu0  ;;  %v2843_v29 = vadd.f32 %v2842_v54, %v2841_v52 }
 0x11e   : > { %v2844_v56 = vpop.f32.mrf.mxu1 }
 0x11f   : > { %v2805_v57 = vpop.f32.mrf.mxu0  ;;  %v1064_v45 = vadd.f32 %v2843_v29, %v2803_v27  ;;  %v3013_v27 = vld [vmem:[%s4042_s9 + $0xa0] ss:$16 sps:$4 sm:$0xff]   ;;  %v3021_v29 = vld [vmem:[%s4042_s9 + $0x84] ss:$16 sps:$4 sm:$0xff]  }
 0x120   : > { %v2845_v58 = vpop.f32.mrf.mxu1  ;;  %v2806_v40 = vadd.f32 %v2805_v57, %v2804_v55 }
 0x121   : > { %v2807_v59 = vpop.f32.mrf.mxu0  ;;  %v2846_v41 = vadd.f32 %v2845_v58, %v2844_v56 }
 0x122   : > { %v2847_v60 = vpop.f32.mrf.mxu1 }
 0x123   : > { %v2808_v61 = vpop.f32.mrf.mxu0 }
 0x124   : > { %v2848_v62 = vpop.f32.mrf.mxu1  ;;  %v2809_v17 = vadd.f32 %v2808_v61, %v2807_v59 }
 0x125   : > { %v2810_v63 = vpop.f32.mrf.mxu0  ;;  %v2849_v18 = vadd.f32 %v2848_v62, %v2847_v60  ;;  %v1067_v60 = vadd.f32 %v2846_v41, %v2806_v40  ;;  %v3057_v40 = vld [vmem:[%s4042_s9 + $0x1c4] ss:$16 sps:$4 sm:$0xff]   ;;  %v3055_v41 = vld [vmem:[%s4042_s9 + $0x1c0] ss:$16 sps:$4 sm:$0xff]  }
 0x126   : > { %v2850_v6 = vpop.f32.mrf.mxu1 }
 0x127   : > { %v2811_v3 = vpop.f32.mrf.mxu0  ;;  %v1072_v28 = vadd.f32 %v2849_v18, %v2809_v17 }
 0x128   : > { %v2851_v19 = vpop.f32.mrf.mxu1  ;;  %v2812_v33 = vadd.f32 %v2811_v3, %v2810_v63 }
 0x129   : > { %v2871_v7 = vpop.f32.mrf.mxu0  ;;  %v2852_v34 = vadd.f32 %v2851_v19, %v2850_v6 }
 0x12a   : > { %v1121_v36 = vadd.f32 %v2871_v7, %v1056_v24  ;;  %v3009_v24 = vld [vmem:[%s4042_s9 + $0xc4] ss:$16 sps:$4 sm:$0xff]  }
 0x12b   : > { %v1112_v16 = vpop.f32.mrf.mxu0  ;;  %v1075_v49 = vadd.f32 %v2852_v34, %v2812_v33  ;;  %v3033_v33 = vld [vmem:[%s4042_s9 + $0x44] ss:$16 sps:$4 sm:$0xff]   ;;  %v3031_v34 = vld [vmem:[%s4042_s9 + $0x40] ss:$16 sps:$4 sm:$0xff]  }
 0x12c   : > { %v1113_v30 = vadd.f32 %v1112_v16, %v1048_v22  ;;  %v1165_v50 = vmul.f32 %v1161_v38, %v1121_v36  ;;  %v3001_v22 = vld [vmem:[%s4042_s9 + $0xe0] ss:$16 sps:$4 sm:$0xff]   ;;  %v3045_v36 = vld [vmem:[%s4042_s9 + $0x4] ss:$16 sps:$4 sm:$0xff]  }
 0x12d   : > { %v2872_v23 = vpop.f32.mrf.mxu0 }
 0x12e   : > { %v1124_v42 = vadd.f32 %v2872_v23, %v1059_v31  ;;  %v1163_v44 = vmul.f32 %v1161_v38, %v1113_v30  ;;  %v1179_v0 = vadd.f32 %v1175_v51, %v1165_v50  ;;  %v3019_v30 = vld [vmem:[%s4042_s9 + $0x80] ss:$16 sps:$4 sm:$0xff]   ;;  %v3027_v31 = vld [vmem:[%s4042_s9 + $0x64] ss:$16 sps:$4 sm:$0xff]  }
 0x12f   : > { %v1115_v32 = vpop.f32.mrf.mxu0  ;;  %v3081_v50 = vld [vmem:[%s4042_s9 + $0x144] ss:$16 sps:$4 sm:$0xff]  }
 0x130   : > { %v1116_v35 = vadd.f32 %v1115_v32, %v1051_v26  ;;  %v1166_v54 = vmul.f32 %v1161_v38, %v1124_v42  ;;  %v1177_v61 = vadd.f32 %v1175_v51, %v1163_v44  ;;  %v1187_v11 = vmax.f32 %v1179_v0, 0.0  ;;  %v3015_v26 = vld [vmem:[%s4042_s9 + $0xa4] ss:$16 sps:$4 sm:$0xff]   ;;  %v3025_v32 = vld [vmem:[%s4042_s9 + $0x60] ss:$16 sps:$4 sm:$0xff]  }
 0x131   : > { %v2875_v39 = vpop.f32.mrf.mxu0  ;;  %v3063_v42 = vld [vmem:[%s4042_s9 + $0x1a4] ss:$16 sps:$4 sm:$0xff]  }
 0x132   : > { %v1137_v43 = vadd.f32 %v2875_v39, %v1072_v28  ;;  %v1164_v47 = vmul.f32 %v1161_v38, %v1116_v35  ;;  %v1180_v2 = vadd.f32 %v1175_v51, %v1166_v54  ;;  %v1185_v6 = vmax.f32 %v1177_v61, 0.0  ;;  %v3039_v35 = vld [vmem:[%s4042_s9 + $0x24] ss:$16 sps:$4 sm:$0xff]   ;;  %v3037_v28 = vld [vmem:[%s4042_s9 + $0x20] ss:$16 sps:$4 sm:$0xff]  }
 0x133   : > { %v1128_v46 = vpop.f32.mrf.mxu0  ;;  %v3049_v39 = vld [vmem:[%s4042_s9 + $0x1e0] ss:$16 sps:$4 sm:$0xff]   ;;  %v3069_v44 = vld [vmem:[%s4042_s9 + $0x184] ss:$16 sps:$4 sm:$0xff]   ;;  %v3088_v61 = vld [vmem:[%s4042_s9 + $0x128] ss:$16 sps:$4 sm:$0xff]  }
 0x134   : > { %v1169_v48 = vmul.f32 %v1161_v38, %v1137_v43  ;;  %v1129_v52 = vadd.f32 %v1128_v46, %v1064_v45  ;;  %v1178_v56 = vadd.f32 %v1175_v51, %v1164_v47  ;;  %v1188_v12 = vmax.f32 %v1180_v2, 0.0  ;;  %v3061_v43 = vld [vmem:[%s4042_s9 + $0x1a0] ss:$16 sps:$4 sm:$0xff]   ;;  %v3075_v46 = vld [vmem:[%s4042_s9 + $0x164] ss:$16 sps:$4 sm:$0xff]  }
 0x135   : > { %v2876_v53 = vpop.f32.mrf.mxu0  ;;  %v1193_v16 = vmax.f32 %v1185_v6, %v1187_v11  ;;  %v3067_v45 = vld [vmem:[%s4042_s9 + $0x180] ss:$16 sps:$4 sm:$0xff]   ;;  %v3078_v47 = vld [vmem:[%s4042_s9 + $0x16c] ss:$16 sps:$4 sm:$0xff]   ;;  %v3087_v54 = vld [vmem:[%s4042_s9 + $0x124] ss:$16 sps:$4 sm:$0xff]  }
 0x136   : > { %v1140_v59 = vadd.f32 %v2876_v53, %v1075_v49  ;;  %v1167_v62 = vmul.f32 %v1161_v38, %v1129_v52  ;;  %v1183_v57 = vadd.f32 %v1175_v51, %v1169_v48  ;;  %v1186_v7 = vmax.f32 %v1178_v56, 0.0  ;;  %v3073_v48 = vld [vmem:[%s4042_s9 + $0x160] ss:$16 sps:$4 sm:$0xff]   ;;  %v3076_v49 = vld [vmem:[%s4042_s9 + $0x168] ss:$16 sps:$4 sm:$0xff]   ;;  %1945 = vmatprep.subr.bf16.mxu0 %v3078_v47 }
 0x137   : > { %v1131_v55 = vpop.f32.mrf.mxu0  ;;  %1946 = vmatpush2.bf16.msra.mxu0 %v3076_v49  ;;  %v3079_v52 = vld [vmem:[%s4042_s9 + $0x140] ss:$16 sps:$4 sm:$0xff]   ;;  %v3082_v53 = vld [vmem:[%s4042_s9 + $0x148] ss:$16 sps:$4 sm:$0xff]   ;;  %v3813_v2 = vsub.s32 1, %v3679_v9 }
 0x138   : > { %v1170_v58 = vmul.f32 %v1161_v38, %v1140_v59  ;;  %v1132_v63 = vadd.f32 %v1131_v55, %v1067_v60  ;;  %v1181_v1 = vadd.f32 %v1175_v51, %v1167_v62  ;;  %v1191_v8 = vmax.f32 %v1183_v57, 0.0  ;;  %v3090_v59 = vld [vmem:[%s4042_s9 + $0x12c] ss:$16 sps:$4 sm:$0xff]   ;;  %v3085_v60 = vld [vmem:[%s4042_s9 + $0x120] ss:$16 sps:$4 sm:$0xff]  }
 0x139   : > { %v1194_v17 = vmax.f32 %v1186_v7, %v1188_v12  ;;  %v3091_v62 = vld [vmem:[%s4042_s9 + $0x100] ss:$16 sps:$4 sm:$0xff]   ;;  %v3093_v55 = vld [vmem:[%s4042_s9 + $0x104] ss:$16 sps:$4 sm:$0xff]   ;;  %v3094_v56 = vld [vmem:[%s4042_s9 + $0x108] ss:$16 sps:$4 sm:$0xff]   ;;  %v1441_v0 = vpop.f32.mrf.mxu0 }
 0x13a   : > { %v1184_v3 = vadd.f32 %v1175_v51, %v1170_v58  ;;  %v1168_v4 = vmul.f32 %v1161_v38, %v1132_v63  ;;  %v1189_v5 = vmax.f32 %v1181_v1, 0.0  ;;  %v3051_v38 = vld [vmem:[%s4042_s9 + $0x1e4] ss:$16 sps:$4 sm:$0xff]   ;;  %v3096_v57 = vld [vmem:[%s4042_s9 + $0x10c] ss:$16 sps:$4 sm:$0xff]  }
 0x13b   : > { %v3099_v58 = vld [vmem:[%s4044_s11 + $0x74] ss:$8 sps:$4 sm:$0xff]   ;;  %v1443_v1 = vpop.f32.mrf.mxu0  ;;  %v3132_v47 = vld [vmem:[%s4044_s11 + $0x124] ss:$8 sps:$4 sm:$0xff]   ;;  %v3130_v49 = vld [vmem:[%s4044_s11 + $0x120] ss:$8 sps:$4 sm:$0xff]  }
 0x13c   : > { %v1182_v10 = vadd.f32 %v1175_v51, %v1168_v4  ;;  %v1195_v13 = vmax.f32 %v1189_v5, %v1191_v8  ;;  %v1192_v14 = vmax.f32 %v1184_v3, 0.0  ;;  %v3084_v51 = vld [vmem:[%s4042_s9 + $0x14c] ss:$16 sps:$4 sm:$0xff]   ;;  %v1450_v4 = vld [vmem:[%s4041_s8] sm:$0x3] }
 0x13d   : > { %1947 = vmatprep.subr.bf16.mxu0 %v3084_v51  ;;  %v3102_v63 = vld [vmem:[%s4044_s11 + $0x174] ss:$8 sps:$4 sm:$0xff]   ;;  %v1445_v5 = vpop.f32.mrf.mxu0  ;;  %v1459_v8 = vrot.slane %v1450_v4, %v3813_v2  ;;  %v1455_v11 = vrot.slane %v1450_v4, %v3682_v21 }
 0x13e   : > { %v1190_v15 = vmax.f32 %v1182_v10, 0.0  ;;  %v1197_v19 = vmax.f32 %v1193_v16, %v1195_v13  ;;  %1948 = vmatpush2.bf16.msra.mxu0 %v3082_v53  ;;  %v3138_v51 = vld [vmem:[%s4044_s11 + $0x114] ss:$8 sps:$4 sm:$0xff]   ;;  %v3136_v53 = vld [vmem:[%s4044_s11 + $0x110] ss:$8 sps:$4 sm:$0xff]  }
 0x13f   : > { %1949 = vmatprep.subr.bf16.mxu0 %v3090_v59  ;;  %v3144_v59 = vld [vmem:[%s4044_s11 + $0x104] ss:$8 sps:$4 sm:$0xff]   ;;  %v3162_v4 = vld [vmem:[%s4044_s11 + $0x1d4] ss:$8 sps:$4 sm:$0xff]  }
 0x140   : > { %v1196_v18 = vmax.f32 %v1190_v15, %v1192_v14  ;;  %v1447_v14 = vpop.f32.mrf.mxu0 }
 0x142   : > { %v1198_v20 = vmax.f32 %v1194_v17, %v1196_v18  ;;  %1950 = vmatpush2.bf16.msra.mxu0 %v3088_v61  ;;  %v3142_v61 = vld [vmem:[%s4044_s11 + $0x100] ss:$8 sps:$4 sm:$0xff]  }
 0x143   : > { %1951 = vmatprep.subr.bf16.mxu0 %v3096_v57  ;;  %v3148_v57 = vld [vmem:[%s4044_s11 + $0x1f0] ss:$8 sps:$4 sm:$0xff]  }
 0x144   : > { %v1224_v23 = vpack.c.bf16 %v1198_v20, %v1197_v19 }
 0x146   : > { %1354 = vmatmul.mubr.bf16.vlgmr.msra.gmra.mxu1 %v1224_v23  ;;  %1952 = vmatpush2.bf16.msra.mxu0 %v3094_v56  ;;  %v3145_v56 = vld [vmem:[%s4044_s11 + $0xf0] ss:$8 sps:$4 sm:$0xff]  }
 0x147   : > { %1879 = vmatpush1.bf16.msra.mxu1 %v3001_v22  ;;  %2415 = vmatprep.subr.bf16.mxu0 %v3102_v63  ;;  %v3156_v63 = vld [vmem:[%s4044_s11 + $0x1e4] ss:$8 sps:$4 sm:$0xff]  }
 0x148   : > { %1880 = vmatprep.subr.bf16.mxu1 %v3009_v24 }
 0x14b   : > { %1881 = vmatpush1.bf16.msra.mxu1 %v3007_v25 }
 0x14c   : > { %1882 = vmatprep.subr.bf16.mxu1 %v3015_v26 }
 0x14f   : > { %1883 = vmatpush1.bf16.msra.mxu1 %v3013_v27  ;;  %v3097_v27 = vld [vmem:[%s4044_s11 + $0x70] ss:$8 sps:$4 sm:$0xff]  }
 0x150   : > { %1884 = vmatprep.subr.bf16.mxu1 %v3021_v29  ;;  %v3100_v29 = vld [vmem:[%s4044_s11 + $0x170] ss:$8 sps:$4 sm:$0xff]  }
 0x153   : > { %1885 = vmatpush1.bf16.msra.mxu1 %v3019_v30 }
 0x154   : > { %1886 = vmatprep.subr.bf16.mxu1 %v3027_v31  ;;  %v3105_v31 = vld [vmem:[%s4044_s11 + $0x64] ss:$8 sps:$4 sm:$0xff]  }
 0x157   : > { %1887 = vmatpush1.bf16.msra.mxu1 %v3025_v32  ;;  %v3108_v32 = vld [vmem:[%s4044_s11 + $0x164] ss:$8 sps:$4 sm:$0xff]  }
 0x158   : > { %1888 = vmatprep.subr.bf16.mxu1 %v3033_v33  ;;  %v3103_v33 = vld [vmem:[%s4044_s11 + $0x60] ss:$8 sps:$4 sm:$0xff]  }
 0x15b   : > { %1889 = vmatpush1.bf16.msra.mxu1 %v3031_v34  ;;  %v3106_v34 = vld [vmem:[%s4044_s11 + $0x160] ss:$8 sps:$4 sm:$0xff]  }
 0x15c   : > { %1890 = vmatprep.subr.bf16.mxu1 %v3039_v35  ;;  %v3111_v35 = vld [vmem:[%s4044_s11 + $0x54] ss:$8 sps:$4 sm:$0xff]  }
 0x15f   : > { %1891 = vmatpush1.bf16.msra.mxu1 %v3037_v28  ;;  %v3114_v28 = vld [vmem:[%s4044_s11 + $0x154] ss:$8 sps:$4 sm:$0xff]  }
 0x160   : > { %1892 = vmatprep.subr.bf16.mxu1 %v3045_v36  ;;  %v3109_v36 = vld [vmem:[%s4044_s11 + $0x50] ss:$8 sps:$4 sm:$0xff]  }
 0x163   : > { %1893 = vmatpush1.bf16.msra.mxu1 %v3043_v37  ;;  %v3112_v37 = vld [vmem:[%s4044_s11 + $0x150] ss:$8 sps:$4 sm:$0xff]  }
 0x164   : > { %1894 = vmatprep.subr.bf16.mxu1 %v3051_v38  ;;  %v3117_v38 = vld [vmem:[%s4044_s11 + $0x44] ss:$8 sps:$4 sm:$0xff]  }
 0x167   : > { %1895 = vmatpush2.bf16.msra.mxu1 %v3049_v39  ;;  %v3120_v39 = vld [vmem:[%s4044_s11 + $0x144] ss:$8 sps:$4 sm:$0xff]  }
 0x168   : > { %1896 = vmatprep.subr.bf16.mxu1 %v3057_v40  ;;  %v3115_v40 = vld [vmem:[%s4044_s11 + $0x40] ss:$8 sps:$4 sm:$0xff]  }
 0x16b   : > { %1897 = vmatpush2.bf16.msra.mxu1 %v3055_v41  ;;  %v3118_v41 = vld [vmem:[%s4044_s11 + $0x140] ss:$8 sps:$4 sm:$0xff]  }
 0x16c   : > { %1898 = vmatprep.subr.bf16.mxu1 %v3063_v42  ;;  %v3123_v42 = vld [vmem:[%s4044_s11 + $0x34] ss:$8 sps:$4 sm:$0xff]  }
 0x16f   : > { %1899 = vmatpush2.bf16.msra.mxu1 %v3061_v43  ;;  %v3126_v43 = vld [vmem:[%s4044_s11 + $0x134] ss:$8 sps:$4 sm:$0xff]  }
 0x170   : > { %1900 = vmatprep.subr.bf16.mxu1 %v3069_v44  ;;  %v3121_v44 = vld [vmem:[%s4044_s11 + $0x30] ss:$8 sps:$4 sm:$0xff]  }
 0x173   : > { %1901 = vmatpush2.bf16.msra.mxu1 %v3067_v45  ;;  %v3124_v45 = vld [vmem:[%s4044_s11 + $0x130] ss:$8 sps:$4 sm:$0xff]  }
 0x174   : > { %1902 = vmatprep.subr.bf16.mxu1 %v3075_v46  ;;  %v3129_v46 = vld [vmem:[%s4044_s11 + $0x24] ss:$8 sps:$4 sm:$0xff]  }
 0x177   : > { %1903 = vmatpush2.bf16.msra.mxu1 %v3073_v48  ;;  %v3127_v48 = vld [vmem:[%s4044_s11 + $0x20] ss:$8 sps:$4 sm:$0xff]  }
 0x178   : > { %1904 = vmatprep.subr.bf16.mxu1 %v3081_v50  ;;  %v3135_v50 = vld [vmem:[%s4044_s11 + $0x14] ss:$8 sps:$4 sm:$0xff]  }
 0x17b   : > { %1905 = vmatpush2.bf16.msra.mxu1 %v3079_v52  ;;  %v3133_v52 = vld [vmem:[%s4044_s11 + $0x10] ss:$8 sps:$4 sm:$0xff]  }
 0x17c   : > { %1906 = vmatprep.subr.bf16.mxu1 %v3087_v54  ;;  %v3141_v54 = vld [vmem:[%s4044_s11 + $0x4] ss:$8 sps:$4 sm:$0xff]  }
 0x17f   : > { %1907 = vmatpush2.bf16.msra.mxu1 %v3085_v60  ;;  %v3139_v60 = vld [vmem:[%s4044_s11] ss:$8 sps:$4 sm:$0xff]  }
 0x180   : > { %1908 = vmatprep.subr.bf16.mxu1 %v3093_v55  ;;  %v3150_v55 = vld [vmem:[%s4044_s11 + $0x1f4] ss:$8 sps:$4 sm:$0xff]  }
 0x183   : > { %1909 = vmatpush2.bf16.msra.mxu1 %v3091_v62  ;;  %v3147_v62 = vld [vmem:[%s4044_s11 + $0xf4] ss:$8 sps:$4 sm:$0xff]  }
 0x184   : > { %2372 = vmatprep.subr.bf16.mxu1 %v3099_v58  ;;  %v3153_v58 = vld [vmem:[%s4044_s11 + $0xe4] ss:$8 sps:$4 sm:$0xff]  }
 0x206   : > { %v1355_v3 = vpop.f32.mrf.mxu1 }
 0x207   : > { %v1442_v10 = vadd.f32 %v1441_v0, %v1355_v3  ;;  %v3151_v0 = vld [vmem:[%s4044_s11 + $0xe0] ss:$8 sps:$4 sm:$0xff]   ;;  %v3159_v3 = vld [vmem:[%s4044_s11 + $0xd4] ss:$8 sps:$4 sm:$0xff]  }
 0x208   : > { %v1357_v6 = vpop.f32.mrf.mxu1 }
 0x209   : > { %v1444_v7 = vadd.f32 %v1443_v1, %v1357_v6  ;;  %v1462_v19 = vadd.f32 %v1455_v11, %v1442_v10  ;;  %v3154_v1 = vld [vmem:[%s4044_s11 + $0x1e0] ss:$8 sps:$4 sm:$0xff]   ;;  %v3160_v6 = vld [vmem:[%s4044_s11 + $0x1d0] ss:$8 sps:$4 sm:$0xff]  }
 0x20a   : > { %v1359_v12 = vpop.f32.mrf.mxu1  ;;  %v3163_v10 = vld [vmem:[%s4044_s11 + $0xc0] ss:$8 sps:$4 sm:$0xff]  }
 0x20b   : > { %v1446_v13 = vadd.f32 %v1445_v5, %v1359_v12  ;;  %v1463_v16 = vadd.f32 %v1459_v8, %v1444_v7  ;;  %v1466_v25 = vmax.f32 %v1462_v19, 0.0  ;;  %v3157_v5 = vld [vmem:[%s4044_s11 + $0xd0] ss:$8 sps:$4 sm:$0xff]   ;;  %v3165_v7 = vld [vmem:[%s4044_s11 + $0xc4] ss:$8 sps:$4 sm:$0xff]  }
 0x20c   : > { %v1361_v15 = vpop.f32.mrf.mxu1  ;;  %v3171_v12 = vld [vmem:[%s4044_s11 + $0xb4] ss:$8 sps:$4 sm:$0xff]   ;;  %v3178_v19 = vld [vmem:[%s4044_s11 + $0x1a0] ss:$8 sps:$4 sm:$0xff]  }
 0x20d   : > { %v1464_v17 = vadd.f32 %v1455_v11, %v1446_v13  ;;  %v1448_v18 = vadd.f32 %v1447_v14, %v1361_v15  ;;  %v1467_v23 = vmax.f32 %v1463_v16, 0.0  ;;  %v3166_v11 = vld [vmem:[%s4044_s11 + $0x1c0] ss:$8 sps:$4 sm:$0xff]   ;;  %v3174_v13 = vld [vmem:[%s4044_s11 + $0x1b4] ss:$8 sps:$4 sm:$0xff]  }
 0x20e   : > { %v3169_v14 = vld [vmem:[%s4044_s11 + $0xb0] ss:$8 sps:$4 sm:$0xff]   ;;  %v3177_v16 = vld [vmem:[%s4044_s11 + $0xa4] ss:$8 sps:$4 sm:$0xff]  }
 0x20f   : > { %v1465_v20 = vadd.f32 %v1459_v8, %v1448_v18  ;;  %v1468_v22 = vmax.f32 %v1464_v17, 0.0  ;;  %v3168_v8 = vld [vmem:[%s4044_s11 + $0x1c4] ss:$8 sps:$4 sm:$0xff]   ;;  %v3172_v15 = vld [vmem:[%s4044_s11 + $0x1b0] ss:$8 sps:$4 sm:$0xff]  }
 0x210   : > { %v3180_v17 = vld [vmem:[%s4044_s11 + $0x1a4] ss:$8 sps:$4 sm:$0xff]   ;;  %v3175_v18 = vld [vmem:[%s4044_s11 + $0xa0] ss:$8 sps:$4 sm:$0xff]  }
 0x211   : > { %v1469_v24 = vmax.f32 %v1465_v20, 0.0  ;;  %v1470_v30 = vpack.c.bf16 %v1468_v22, %v1466_v25  ;;  %v3183_v20 = vld [vmem:[%s4044_s11 + $0x94] ss:$8 sps:$4 sm:$0xff]   ;;  %v3189_v25 = vld [vmem:[%s4044_s11 + $0x84] ss:$8 sps:$4 sm:$0xff]  }
 0x212   : > { %v3186_v22 = vld [vmem:[%s4044_s11 + $0x194] ss:$8 sps:$4 sm:$0xff]  }
 0x213   : > { %v1471_v26 = vpack.c.bf16 %v1469_v24, %v1467_v23  ;;  %v3181_v23 = vld [vmem:[%s4044_s11 + $0x90] ss:$8 sps:$4 sm:$0xff]  }
 0x214   : > { %v3184_v24 = vld [vmem:[%s4044_s11 + $0x190] ss:$8 sps:$4 sm:$0xff]  }
 0x215   : > { %1910 = vmatprep.mubr.bf16.mxu1 %v1471_v26  ;;  %1953 = vmatprep.mubr.bf16.mxu0 %v1471_v26  ;;  %v3192_v26 = vld [vmem:[%s4044_s11 + $0x184] ss:$8 sps:$4 sm:$0xff]  }
 0x216   : > { %1911 = vmatmul.mubr.bf16.vlgmr.msra.gmra.mxu1 %v1470_v30  ;;  %1954 = vmatmul.mubr.bf16.vlgmr.msra.gmra.mxu0 %v1470_v30  ;;  %v1552_v30 = vsub.s32 3, %v3679_v9 }
 0x217   : > { %2373 = vmatpush1.bf16.msra.mxu1 %v3097_v27  ;;  %2416 = vmatpush1.bf16.msra.mxu0 %v3100_v29  ;;  %v3187_v27 = vld [vmem:[%s4044_s11 + $0x80] ss:$8 sps:$4 sm:$0xff]  }
 0x218   : > { %2374 = vmatprep.subr.bf16.mxu1 %v3105_v31  ;;  %2417 = vmatprep.subr.bf16.mxu0 %v3108_v32  ;;  %v3190_v29 = vld [vmem:[%s4044_s11 + $0x180] ss:$8 sps:$4 sm:$0xff]   ;;  %v1548_v31 = vsub.s32 2, %v3679_v9 }
 0x219   : > { %v1536_v32 = vld [vmem:[%s4043_s10] sm:$0xf] }
 0x21b   : > { %2375 = vmatpush1.bf16.msra.mxu1 %v3103_v33  ;;  %2418 = vmatpush1.bf16.msra.mxu0 %v3106_v34 }
 0x21c   : > { %2376 = vmatprep.subr.bf16.mxu1 %v3111_v35  ;;  %2419 = vmatprep.subr.bf16.mxu0 %v3114_v28  ;;  %v1545_v35 = vrot.slane %v1536_v32, %v3813_v2  ;;  %v1553_v28 = vrot.slane %v1536_v32, %v1552_v30 }
 0x21f   : > { %2377 = vmatpush1.bf16.msra.mxu1 %v3109_v36  ;;  %2420 = vmatpush1.bf16.msra.mxu0 %v3112_v37  ;;  %v1541_v36 = vrot.slane %v1536_v32, %v3682_v21  ;;  %v1549_v37 = vrot.slane %v1536_v32, %v1548_v31 }
 0x220   : > { %2378 = vmatprep.subr.bf16.mxu1 %v3117_v38  ;;  %2421 = vmatprep.subr.bf16.mxu0 %v3120_v39 }
 0x223   : > { %2379 = vmatpush1.bf16.msra.mxu1 %v3115_v40  ;;  %2422 = vmatpush1.bf16.msra.mxu0 %v3118_v41 }
 0x224   : > { %2380 = vmatprep.subr.bf16.mxu1 %v3123_v42  ;;  %2423 = vmatprep.subr.bf16.mxu0 %v3126_v43 }
 0x227   : > { %2381 = vmatpush1.bf16.msra.mxu1 %v3121_v44  ;;  %2424 = vmatpush1.bf16.msra.mxu0 %v3124_v45 }
 0x228   : > { %2382 = vmatprep.subr.bf16.mxu1 %v3129_v46  ;;  %2425 = vmatprep.subr.bf16.mxu0 %v3132_v47 }
 0x22b   : > { %2383 = vmatpush1.bf16.msra.mxu1 %v3127_v48  ;;  %2426 = vmatpush1.bf16.msra.mxu0 %v3130_v49 }
 0x22c   : > { %2384 = vmatprep.subr.bf16.mxu1 %v3135_v50  ;;  %2427 = vmatprep.subr.bf16.mxu0 %v3138_v51 }
 0x22f   : > { %2385 = vmatpush1.bf16.msra.mxu1 %v3133_v52  ;;  %2428 = vmatpush1.bf16.msra.mxu0 %v3136_v53 }
 0x230   : > { %2386 = vmatprep.subr.bf16.mxu1 %v3141_v54  ;;  %2429 = vmatprep.subr.bf16.mxu0 %v3144_v59 }
 0x233   : > { %2387 = vmatpush1.bf16.msra.mxu1 %v3139_v60  ;;  %2430 = vmatpush1.bf16.msra.mxu0 %v3142_v61 }
 0x234   : > { %2388 = vmatprep.subr.bf16.mxu1 %v3147_v62  ;;  %2431 = vmatprep.subr.bf16.mxu0 %v3150_v55 }
 0x237   : > { %2389 = vmatpush2.bf16.msra.mxu1 %v3145_v56  ;;  %2432 = vmatpush2.bf16.msra.mxu0 %v3148_v57 }
 0x238   : > { %2390 = vmatprep.subr.bf16.mxu1 %v3153_v58  ;;  %2433 = vmatprep.subr.bf16.mxu0 %v3156_v63  ;;  %v2040_v63 = vld [vmem:[%s4045_s12] sm:$0x3] }
 0x23b   : > { %2391 = vmatpush2.bf16.msra.mxu1 %v3151_v0  ;;  %2434 = vmatpush2.bf16.msra.mxu0 %v3154_v1  ;;  %v2045_v0 = vrot.slane %v2040_v63, %v3682_v21  ;;  %v2049_v1 = vrot.slane %v2040_v63, %v3813_v2 }
 0x23c   : > { %2392 = vmatprep.subr.bf16.mxu1 %v3159_v3  ;;  %2435 = vmatprep.subr.bf16.mxu0 %v3162_v4 }
 0x23f   : > { %2393 = vmatpush2.bf16.msra.mxu1 %v3157_v5  ;;  %2436 = vmatpush2.bf16.msra.mxu0 %v3160_v6 }
 0x240   : > { %2394 = vmatprep.subr.bf16.mxu1 %v3165_v7  ;;  %2437 = vmatprep.subr.bf16.mxu0 %v3168_v8 }
 0x243   : > { %2395 = vmatpush2.bf16.msra.mxu1 %v3163_v10  ;;  %2438 = vmatpush2.bf16.msra.mxu0 %v3166_v11 }
 0x244   : > { %2396 = vmatprep.subr.bf16.mxu1 %v3171_v12  ;;  %2439 = vmatprep.subr.bf16.mxu0 %v3174_v13 }
 0x247   : > { %2397 = vmatpush2.bf16.msra.mxu1 %v3169_v14  ;;  %2440 = vmatpush2.bf16.msra.mxu0 %v3172_v15 }
 0x248   : > { %2398 = vmatprep.subr.bf16.mxu1 %v3177_v16  ;;  %2441 = vmatprep.subr.bf16.mxu0 %v3180_v17 }
 0x24b   : > { %2399 = vmatpush2.bf16.msra.mxu1 %v3175_v18  ;;  %2442 = vmatpush2.bf16.msra.mxu0 %v3178_v19 }
 0x24c   : > { %2400 = vmatprep.subr.bf16.mxu1 %v3183_v20  ;;  %2443 = vmatprep.subr.bf16.mxu0 %v3186_v22 }
 0x24f   : > { %2401 = vmatpush2.bf16.msra.mxu1 %v3181_v23  ;;  %2444 = vmatpush2.bf16.msra.mxu0 %v3184_v24 }
 0x250   : > { %2402 = vmatprep.subr.bf16.mxu1 %v3189_v25  ;;  %2445 = vmatprep.subr.bf16.mxu0 %v3192_v26 }
 0x253   : > { %2403 = vmatpush2.bf16.msra.mxu1 %v3187_v27  ;;  %2446 = vmatpush2.bf16.msra.mxu0 %v3190_v29 }
 0x2d6   : > { %v1912_v33 = vpop.f32.mrf.mxu1  ;;  %v1955_v34 = vpop.f32.mrf.mxu0 }
 0x2d7   : > { %v1913_v45 = vadd.f32 %v1912_v33, %v1541_v36  ;;  %v1956_v46 = vadd.f32 %v1955_v34, %v1549_v37 }
 0x2d8   : > { %v1914_v38 = vpop.f32.mrf.mxu1  ;;  %v1957_v39 = vpop.f32.mrf.mxu0 }
 0x2d9   : > { %v1915_v42 = vadd.f32 %v1914_v38, %v1545_v35  ;;  %v1958_v43 = vadd.f32 %v1957_v39, %v1553_v28  ;;  %v1964_v61 = vmax.f32 %v1913_v45, 0.0  ;;  %v1966_v62 = vmax.f32 %v1956_v46, 0.0 }
 0x2da   : > { %v1916_v40 = vpop.f32.mrf.mxu1  ;;  %v1959_v41 = vpop.f32.mrf.mxu0 }
 0x2db   : > { %v1917_v44 = vadd.f32 %v1916_v40, %v1541_v36  ;;  %v1960_v9 = vadd.f32 %v1959_v41, %v1549_v37  ;;  %v1965_v53 = vmax.f32 %v1915_v42, 0.0  ;;  %v1967_v54 = vmax.f32 %v1958_v43, 0.0 }
 0x2dc   : > { %v1918_v47 = vpop.f32.mrf.mxu1  ;;  %v1961_v48 = vpop.f32.mrf.mxu0 }
 0x2dd   : > { %v1919_v49 = vadd.f32 %v1918_v47, %v1545_v35  ;;  %v1962_v50 = vadd.f32 %v1961_v48, %v1553_v28  ;;  %v1968_v51 = vmax.f32 %v1917_v44, 0.0  ;;  %v1970_v52 = vmax.f32 %v1960_v9, 0.0 }
 0x2df   : > { %v1969_v59 = vmax.f32 %v1919_v49, 0.0  ;;  %v1971_v60 = vmax.f32 %v1962_v50, 0.0  ;;  %v1972_v57 = vpack.c.bf16 %v1968_v51, %v1964_v61  ;;  %v1974_v58 = vpack.c.bf16 %v1970_v52, %v1966_v62 }
 0x2e1   : > { %v1973_v55 = vpack.c.bf16 %v1969_v59, %v1965_v53  ;;  %v1975_v56 = vpack.c.bf16 %v1971_v60, %v1967_v54 }
 0x2e3   : > { %2404 = vmatprep.mubr.bf16.mxu1 %v1973_v55  ;;  %2447 = vmatprep.mubr.bf16.mxu0 %v1975_v56 }
 0x2e4   : > { %2405 = vmatmul.mubr.bf16.vlgmr.msra.gmra.mxu1 %v1972_v57  ;;  %2448 = vmatmul.mubr.bf16.vlgmr.msra.gmra.mxu0 %v1974_v58 }
 0x3a4   : > { %v2406_v3 = vpop.f32.mrf.mxu1  ;;  %v2449_v4 = vpop.f32.mrf.mxu0 }
 0x3a5   : > { %v2407_v5 = vadd.f32 %v2406_v3, %v2045_v0 }
 0x3a6   : > { %v2408_v6 = vpop.f32.mrf.mxu1  ;;  %v2451_v7 = vpop.f32.mrf.mxu0 }
 0x3a7   : > { %v2450_v8 = vadd.f32 %v2449_v4, %v2407_v5  ;;  %v2409_v10 = vadd.f32 %v2408_v6, %v2049_v1 }
 0x3a8   : > { %v2410_v11 = vpop.f32.mrf.mxu1  ;;  %v2453_v12 = vpop.f32.mrf.mxu0 }
 0x3a9   : > { %2458 = vst [vmem:[%s520_s18] sm:$0xff] %v2450_v8  ;;  %v2452_v13 = vadd.f32 %v2451_v7, %v2409_v10  ;;  %v2411_v14 = vadd.f32 %v2410_v11, %v2045_v0 }
 0x3aa   : > { %v2412_v21 = vpop.f32.mrf.mxu1  ;;  %v2455_v16 = vpop.f32.mrf.mxu0 }
 0x3ab   : > { %2459 = vst [vmem:[%s520_s18 + $0x8] sm:$0xff] %v2452_v13  ;;  %v2454_v15 = vadd.f32 %v2453_v12, %v2411_v14  ;;  %v2413_v2 = vadd.f32 %v2412_v21, %v2049_v1 }
 0x3ad   : > { %2460 = vst [vmem:[%s520_s18 + $0x10] sm:$0xff] %v2454_v15  ;;  %v2456_v17 = vadd.f32 %v2455_v16, %v2413_v2 }
 0x3af   : > { %2461 = vst [vmem:[%s520_s18 + $0x18] sm:$0xff] %v2456_v17 }
 0x3b0 PF: > { %p20_p9 = scmp.ge.s32.totalorder %s3307_s29, 4   ;;  %s4047_s25 = smov %s3213_s26 }
 0x3b1   : > { %s4048_s26 = smov %s3316_s15  ;;  %s4049_s27 = smov %s3307_s29 }
 0x3b2   :  { %22 = sbr.rel (!%p20_p9) target bundleno = 2 (0x2), region = 139 }

</bundles_post_ra>
